<compile_context>
chip_gen: v7x
topology: tpu7x:2x2x1
jax: 0.10.0
libtpu: 0.0.40
codegen_flags: <defaults>
</compile_context>

<pallas_src>
import jax
import jax.numpy as jnp
from jax import lax
from jax.experimental import pallas as pl
from jax.experimental.pallas import tpu as pltpu


def _basic_block_kernel(lhs1_ref, w1b_ref, b1w_ref, m_ref, b2w_ref,
                        xid_ref, mup_ref, mdn_ref, o_ref):
    """Fused conv3x3 -> BN -> ReLU -> conv3x3 -> BN -> +identity -> ReLU.

    lhs1_ref : (N*H, 3*(W+2)*Cin)  conv1 im2col rows (built in the wrapper)
    w1b_ref  : (3*(W+2)*Cin, (W+2)*C1)  banded conv1 weight, BN1 scale folded
    b1w_ref  : (1, (W+2)*C1)       BN1 bias, zero at the W padding columns
    m_ref    : (3, (W+2)*C1, W*Cout)  banded conv2 weights per kh tap, BN2
                                      scale folded
    b2w_ref  : (1, W*Cout)         BN2 bias tiled across W
    xid_ref  : (N*H, W*Cout)       lane-dense identity (residual input)
    mup/mdn  : (N*H, 1)            0/1 masks for rows that cross an image
                                   border after the sublane roll
    o_ref    : (N*H, W*Cout)       lane-dense output (128 lanes here)
    """
    # conv1 (+ folded BN1 scale) as a single wide matmul, then bias + ReLU.
    # a1 layout: (N*H, (W+2)*C1) with zero columns at the W borders — exactly
    # the padding conv2 needs — kept zero by the zeroed bias columns.
    a1 = jnp.dot(lhs1_ref[...], w1b_ref[...],
                 preferred_element_type=jnp.float32)
    a1 = jnp.maximum(a1 + b1w_ref[...], 0.0)

    # Rows h-1 / h+1 for the kh=0 / kh=2 taps of conv2: XLU sublane rotate
    # plus a 0/1 mask that zeroes rows that wrapped across an image border.
    rows = a1.shape[0]
    up = pltpu.roll(a1, shift=1, axis=0) * mup_ref[...]
    dn = pltpu.roll(a1, shift=rows - 1, axis=0) * mdn_ref[...]

    # conv2 (+ folded BN2 scale): one 288-wide matmul per kh tap.
    acc = jnp.dot(up, m_ref[0], preferred_element_type=jnp.float32)
    acc = acc + jnp.dot(a1, m_ref[1], preferred_element_type=jnp.float32)
    acc = acc + jnp.dot(dn, m_ref[2], preferred_element_type=jnp.float32)

    # BN2 bias + residual + ReLU on full 128-lane vregs; full-width store.
    y = jnp.maximum(acc + b2w_ref[...] + xid_ref[...], 0.0)
    o_ref[...] = y.astype(o_ref.dtype)


def _expand_conv1(w1, s1, b1, W, Cin, C1):
    """Banded conv1 weight: folds the 3 kw taps, the W zero-padding of the
    conv1 OUTPUT, and the BN1 scale into a (3*(W+2)*Cin, (W+2)*C1) matrix.
    Returns it plus the matching (1, (W+2)*C1) bias row (zero at padding)."""
    w1_k = w1.reshape(3, 3, Cin, C1)
    wp = jnp.arange(W + 2)            # lhs (padded input) column
    wq = jnp.arange(W + 2)            # a1 (padded output) column
    kw = wp[:, None] - wq[None, :] + 1
    valid = (kw >= 0) & (kw <= 2) & (wq[None, :] >= 1) & (wq[None, :] <= W)
    big = w1_k[:, jnp.clip(kw, 0, 2), :, :]           # (3, W+2, W+2, Cin, C1)
    big = jnp.where(valid[None, :, :, None, None], big, 0.0)
    big = big * s1.reshape(1, 1, 1, 1, C1)            # fold BN1 scale
    big = big.transpose(0, 1, 3, 2, 4).reshape(3 * (W + 2) * Cin,
                                               (W + 2) * C1)
    b1w = jnp.tile(b1.reshape(1, C1), (1, W + 2))
    colq = jnp.arange((W + 2) * C1) // C1
    b1w = jnp.where((colq >= 1) & (colq <= W), b1w, 0.0)
    return big, b1w


def _expand_conv2(w2, s2, W, C1, Cout):
    """Per-kh banded conv2 weights: fold the 3 kw taps and the BN2 scale into
    a (3, (W+2)*C1, W*Cout) stack."""
    w2_k = w2.reshape(3, 3, C1, Cout)
    wq = jnp.arange(W + 2)            # column of the W-padded a1 rows
    wo = jnp.arange(W)                # output column
    kw = wq[:, None] - wo[None, :]
    valid = (kw >= 0) & (kw <= 2)
    big = w2_k[:, jnp.clip(kw, 0, 2), :, :]           # (3, W+2, W, C1, Cout)
    big = jnp.where(valid[None, :, :, None, None], big, 0.0)
    big = big * s2.reshape(1, 1, 1, 1, Cout)          # fold BN2 scale
    return big.transpose(0, 1, 3, 2, 4).reshape(3, (W + 2) * C1, W * Cout)


def basic_block_pallas(x_nhwc, w1, s1, b1, w2, s2, b2):
    """x_nhwc: (N, H, W, Cin) f32; w1: (9, Cin, C1); w2: (9, C1, Cin);
    s*/b*: folded eval-mode BN scale/bias, shape (C,).  Returns (N,H,W,Cin)."""
    N, H, W, Cin = x_nhwc.shape
    C1 = w1.shape[-1]
    Cout = w2.shape[-1]
    assert Cout == Cin, "downsample=None requires conv2 out channels == inplanes"

    M = N * H                  # matmul M dimension (batch folded in)
    K1 = 3 * (W + 2) * Cin     # conv1 contraction width
    Kp = (W + 2) * C1          # W-padded conv1 activation width
    L = W * Cout               # output lane width (16 * 8 = 128 here)

    # conv1 im2col lhs depends only on the input -> built outside the kernel.
    # Row (n, h) holds x_pad[n, h:h+3, :, :] flattened (kh-major).
    x_pad = jnp.pad(x_nhwc, ((0, 0), (1, 1), (1, 1), (0, 0)))
    lhs1 = jnp.stack([x_pad[:, kh:kh + H, :, :] for kh in range(3)], axis=2)
    lhs1 = lhs1.reshape(M, K1)

    w1b, b1w = _expand_conv1(w1, s1, b1, W, Cin, C1)
    m2 = _expand_conv2(w2, s2, W, C1, Cout)
    b2w = jnp.tile(b2.reshape(1, Cout), (1, W))       # (1, W*Cout)

    xid = x_nhwc.reshape(M, W * Cin)                  # lane-dense identity

    # 0/1 masks: zero the rolled-in rows that crossed an image border.
    h_idx = jnp.arange(M) % H
    mup = (h_idx != 0).astype(jnp.float32).reshape(M, 1)
    mdn = (h_idx != H - 1).astype(jnp.float32).reshape(M, 1)

    out = pl.pallas_call(
        _basic_block_kernel,
        out_shape=jax.ShapeDtypeStruct((M, L), jnp.float32),
        grid_spec=pltpu.PrefetchScalarGridSpec(
            num_scalar_prefetch=0,
            grid=(1,),    # batch folded into M; on v7x use grid=(N,) parallel
            in_specs=[
                pl.BlockSpec((M, K1), lambda i: (0, 0)),
                pl.BlockSpec((K1, Kp), lambda i: (0, 0)),
                pl.BlockSpec((1, Kp), lambda i: (0, 0)),
                pl.BlockSpec((3, Kp, L), lambda i: (0, 0, 0)),
                pl.BlockSpec((1, L), lambda i: (0, 0)),
                pl.BlockSpec((M, L), lambda i: (0, 0)),
                pl.BlockSpec((M, 1), lambda i: (0, 0)),
                pl.BlockSpec((M, 1), lambda i: (0, 0)),
            ],
            out_specs=pl.BlockSpec((M, L), lambda i: (0, 0)),
        ),
        compiler_params=pltpu.CompilerParams(
            dimension_semantics=("arbitrary",)),
    )(lhs1, w1b, b1w, m2, b2w, xid, mup, mdn)

    return out.reshape(N, H, W, Cout)


def basic_block_reference(x_nhwc, w1, s1, b1, w2, s2, b2):
    """Pure-JAX reference (lax conv) of the same forward pass."""
    def conv(x, w_flat):
        w_hwio = w_flat.reshape((3, 3) + w_flat.shape[1:])
        return lax.conv_general_dilated(
            x, w_hwio, window_strides=(1, 1), padding="SAME",
            dimension_numbers=("NHWC", "HWIO", "NHWC"))

    out = conv(x_nhwc, w1) * s1 + b1
    out = jnp.maximum(out, 0.0)
    out = conv(out, w2) * s2 + b2
    out = out + x_nhwc
    return jnp.maximum(out, 0.0)


def fold_bn(gamma, beta, mean, var, eps=1e-5):
    scale = gamma / jnp.sqrt(var + eps)
    bias = beta - mean * scale
    return scale, bias


if __name__ == "__main__":
    # BasicBlock(inplanes=8, planes_1=16, planes_2=0, stride=1, downsample=None)
    N, H, W = 2, 16, 16
    inplanes, planes_1 = 8, 16
    cout = inplanes  # planes_2 == 0  ->  conv2: planes_1 -> inplanes

    key = jax.random.PRNGKey(0)
    ks = jax.random.split(key, 11)

    # Input (NHWC; equivalent to an (N, C, H, W) PyTorch input transposed).
    x = jax.random.normal(ks[0], (N, H, W, inplanes), jnp.float32)

    # conv1: 3x3, inplanes -> planes_1, no bias.  Stored as (9, Cin, Cout).
    w1 = jax.random.normal(ks[1], (9, inplanes, planes_1), jnp.float32) * 0.1
    # conv2: 3x3, planes_1 -> inplanes, no bias.
    w2 = jax.random.normal(ks[2], (9, planes_1, cout), jnp.float32) * 0.1

    # BN params (deterministic, non-trivial), eval-mode folding.
    g1 = 1.0 + 0.1 * jax.random.normal(ks[3], (planes_1,), jnp.float32)
    be1 = 0.1 * jax.random.normal(ks[4], (planes_1,), jnp.float32)
    rm1 = 0.1 * jax.random.normal(ks[5], (planes_1,), jnp.float32)
    rv1 = jnp.abs(jax.random.normal(ks[6], (planes_1,), jnp.float32)) + 0.5
    g2 = 1.0 + 0.1 * jax.random.normal(ks[7], (cout,), jnp.float32)
    be2 = 0.1 * jax.random.normal(ks[8], (cout,), jnp.float32)
    rm2 = 0.1 * jax.random.normal(ks[9], (cout,), jnp.float32)
    rv2 = jnp.abs(jax.random.normal(ks[10], (cout,), jnp.float32)) + 0.5

    s1, b1 = fold_bn(g1, be1, rm1, rv1)
    s2, b2 = fold_bn(g2, be2, rm2, rv2)

    out = basic_block_pallas(x, w1, s1, b1, w2, s2, b2)
    out = jax.block_until_ready(out)

    ref = basic_block_reference(x, w1, s1, b1, w2, s2, b2)
    assert out.shape == (N, H, W, cout)
    err = float(jnp.max(jnp.abs(out - ref)))
    assert jnp.allclose(out, ref, atol=1e-4, rtol=1e-4), err

    print("KERNEL_OK")
</pallas_src>

<mosaic_0001>
module attributes {stable_mosaic.version = 11 : i64} {
  func.func @_basic_block_kernel(%arg0: i32, %arg1: memref<32x432xf32, #tpu.memory_space<vmem>>, %arg2: memref<432x288xf32, #tpu.memory_space<vmem>>, %arg3: memref<1x288xf32, #tpu.memory_space<vmem>>, %arg4: memref<3x288x128xf32, #tpu.memory_space<vmem>>, %arg5: memref<1x128xf32, #tpu.memory_space<vmem>>, %arg6: memref<32x128xf32, #tpu.memory_space<vmem>>, %arg7: memref<32x1xf32, #tpu.memory_space<vmem>>, %arg8: memref<32x1xf32, #tpu.memory_space<vmem>>, %arg9: memref<32x128xf32, #tpu.memory_space<vmem>>) attributes {dimension_semantics = [#tpu.dimension_semantics<arbitrary>], iteration_bounds = array<i64: 1>, scalar_prefetch = 0 : i64, scratch_operands = 0 : i64, tpu.core_type = #tpu.core_type<tc>, window_params = [{pipeline_mode = #tpu.pipeline_mode<synchronous>, transform_indices = @transform_0, window_bounds = array<i64: 32, 432>}, {pipeline_mode = #tpu.pipeline_mode<synchronous>, transform_indices = @transform_1, window_bounds = array<i64: 432, 288>}, {pipeline_mode = #tpu.pipeline_mode<synchronous>, transform_indices = @transform_2, window_bounds = array<i64: 1, 288>}, {pipeline_mode = #tpu.pipeline_mode<synchronous>, transform_indices = @transform_3, window_bounds = array<i64: 3, 288, 128>}, {pipeline_mode = #tpu.pipeline_mode<synchronous>, transform_indices = @transform_4, window_bounds = array<i64: 1, 128>}, {pipeline_mode = #tpu.pipeline_mode<synchronous>, transform_indices = @transform_5, window_bounds = array<i64: 32, 128>}, {pipeline_mode = #tpu.pipeline_mode<synchronous>, transform_indices = @transform_6, window_bounds = array<i64: 32, 1>}, {pipeline_mode = #tpu.pipeline_mode<synchronous>, transform_indices = @transform_7, window_bounds = array<i64: 32, 1>}, {pipeline_mode = #tpu.pipeline_mode<synchronous>, transform_indices = @transform_8, window_bounds = array<i64: 32, 128>}]} {
    %c0 = arith.constant 0 : index
    %c0_0 = arith.constant 0 : index
    %0 = vector.load %arg1[%c0, %c0_0] : memref<32x432xf32, #tpu.memory_space<vmem>>, vector<32x432xf32>
    %c0_1 = arith.constant 0 : index
    %c0_2 = arith.constant 0 : index
    %1 = vector.load %arg2[%c0_1, %c0_2] : memref<432x288xf32, #tpu.memory_space<vmem>>, vector<432x288xf32>
    %cst = arith.constant dense<0.000000e+00> : vector<32x288xf32>
    %2 = tpu.matmul %0, %1, %cst {dimension_numbers = #tpu.dot_dimension_numbers<[1], [0], [0], [1], [0, 0, 1, 1], [], []>} : vector<32x432xf32>, vector<432x288xf32>, vector<32x288xf32> -> vector<32x288xf32>
    %c0_3 = arith.constant 0 : index
    %c0_4 = arith.constant 0 : index
    %3 = vector.load %arg3[%c0_3, %c0_4] : memref<1x288xf32, #tpu.memory_space<vmem>>, vector<1x288xf32>
    %4 = vector.broadcast %3 : vector<1x288xf32> to vector<32x288xf32>
    %5 = arith.addf %2, %4 : vector<32x288xf32>
    %cst_5 = arith.constant 0.000000e+00 : f32
    %6 = vector.broadcast %cst_5 : f32 to vector<32x288xf32>
    %7 = arith.maximumf %5, %6 : vector<32x288xf32>
    %c1_i32 = arith.constant 1 : i32
    %8 = tpu.dynamic_rotate %7 by %c1_i32 dim 0 : vector<32x288xf32>, i32 -> vector<32x288xf32>
    %c0_6 = arith.constant 0 : index
    %c0_7 = arith.constant 0 : index
    %9 = vector.load %arg7[%c0_6, %c0_7] : memref<32x1xf32, #tpu.memory_space<vmem>>, vector<32x1xf32>
    %10 = vector.broadcast %9 : vector<32x1xf32> to vector<32x288xf32>
    %11 = arith.mulf %8, %10 : vector<32x288xf32>
    %c31_i32 = arith.constant 31 : i32
    %12 = tpu.dynamic_rotate %7 by %c31_i32 dim 0 : vector<32x288xf32>, i32 -> vector<32x288xf32>
    %c0_8 = arith.constant 0 : index
    %c0_9 = arith.constant 0 : index
    %13 = vector.load %arg8[%c0_8, %c0_9] : memref<32x1xf32, #tpu.memory_space<vmem>>, vector<32x1xf32>
    %14 = vector.broadcast %13 : vector<32x1xf32> to vector<32x288xf32>
    %15 = arith.mulf %12, %14 : vector<32x288xf32>
    %c0_10 = arith.constant 0 : index
    %c0_11 = arith.constant 0 : index
    %c0_12 = arith.constant 0 : index
    %16 = vector.load %arg4[%c0_10, %c0_11, %c0_12] : memref<3x288x128xf32, #tpu.memory_space<vmem>>, vector<1x288x128xf32>
    %17 = vector.shape_cast %16 : vector<1x288x128xf32> to vector<288x128xf32>
    %cst_13 = arith.constant dense<0.000000e+00> : vector<32x128xf32>
    %18 = tpu.matmul %11, %17, %cst_13 {dimension_numbers = #tpu.dot_dimension_numbers<[1], [0], [0], [1], [0, 0, 1, 1], [], []>} : vector<32x288xf32>, vector<288x128xf32>, vector<32x128xf32> -> vector<32x128xf32>
    %c1 = arith.constant 1 : index
    %c0_14 = arith.constant 0 : index
    %c0_15 = arith.constant 0 : index
    %19 = vector.load %arg4[%c1, %c0_14, %c0_15] : memref<3x288x128xf32, #tpu.memory_space<vmem>>, vector<1x288x128xf32>
    %20 = vector.shape_cast %19 : vector<1x288x128xf32> to vector<288x128xf32>
    %cst_16 = arith.constant dense<0.000000e+00> : vector<32x128xf32>
    %21 = tpu.matmul %7, %20, %cst_16 {dimension_numbers = #tpu.dot_dimension_numbers<[1], [0], [0], [1], [0, 0, 1, 1], [], []>} : vector<32x288xf32>, vector<288x128xf32>, vector<32x128xf32> -> vector<32x128xf32>
    %22 = arith.addf %18, %21 : vector<32x128xf32>
    %c2 = arith.constant 2 : index
    %c0_17 = arith.constant 0 : index
    %c0_18 = arith.constant 0 : index
    %23 = vector.load %arg4[%c2, %c0_17, %c0_18] : memref<3x288x128xf32, #tpu.memory_space<vmem>>, vector<1x288x128xf32>
    %24 = vector.shape_cast %23 : vector<1x288x128xf32> to vector<288x128xf32>
    %cst_19 = arith.constant dense<0.000000e+00> : vector<32x128xf32>
    %25 = tpu.matmul %15, %24, %cst_19 {dimension_numbers = #tpu.dot_dimension_numbers<[1], [0], [0], [1], [0, 0, 1, 1], [], []>} : vector<32x288xf32>, vector<288x128xf32>, vector<32x128xf32> -> vector<32x128xf32>
    %26 = arith.addf %22, %25 : vector<32x128xf32>
    %c0_20 = arith.constant 0 : index
    %c0_21 = arith.constant 0 : index
    %27 = vector.load %arg5[%c0_20, %c0_21] : memref<1x128xf32, #tpu.memory_space<vmem>>, vector<1x128xf32>
    %28 = vector.broadcast %27 : vector<1x128xf32> to vector<32x128xf32>
    %29 = arith.addf %26, %28 : vector<32x128xf32>
    %c0_22 = arith.constant 0 : index
    %c0_23 = arith.constant 0 : index
    %30 = vector.load %arg6[%c0_22, %c0_23] : memref<32x128xf32, #tpu.memory_space<vmem>>, vector<32x128xf32>
    %31 = arith.addf %29, %30 : vector<32x128xf32>
    %cst_24 = arith.constant 0.000000e+00 : f32
    %32 = vector.broadcast %cst_24 : f32 to vector<32x128xf32>
    %33 = arith.maximumf %31, %32 : vector<32x128xf32>
    %c0_25 = arith.constant 0 : index
    %c0_26 = arith.constant 0 : index
    %34 = vector.load %arg9[%c0_25, %c0_26] : memref<32x128xf32, #tpu.memory_space<vmem>>, vector<32x128xf32>
    tpu.vector_store %arg9[%c0_25, %c0_26], %33 {strides = array<i32>} : memref<32x128xf32, #tpu.memory_space<vmem>>, vector<32x128xf32>,
    return
  }
  func.func @transform_0(%arg0: i32) -> (i32, i32) {
    %c0_i32 = arith.constant 0 : i32
    %c0_i32_0 = arith.constant 0 : i32
    %c0_i32_1 = arith.constant 0 : i32
    return %c0_i32, %c0_i32_0 : i32, i32
  }
  func.func @transform_1(%arg0: i32) -> (i32, i32) {
    %c0_i32 = arith.constant 0 : i32
    %c0_i32_0 = arith.constant 0 : i32
    %c0_i32_1 = arith.constant 0 : i32
    return %c0_i32, %c0_i32_0 : i32, i32
  }
  func.func @transform_2(%arg0: i32) -> (i32, i32) {
    %c0_i32 = arith.constant 0 : i32
    %c0_i32_0 = arith.constant 0 : i32
    %c0_i32_1 = arith.constant 0 : i32
    return %c0_i32, %c0_i32_0 : i32, i32
  }
  func.func @transform_3(%arg0: i32) -> (i32, i32, i32) {
    %c0_i32 = arith.constant 0 : i32
    %c0_i32_0 = arith.constant 0 : i32
    %c0_i32_1 = arith.constant 0 : i32
    %c0_i32_2 = arith.constant 0 : i32
    return %c0_i32, %c0_i32_0, %c0_i32_1 : i32, i32, i32
  }
  func.func @transform_4(%arg0: i32) -> (i32, i32) {
    %c0_i32 = arith.constant 0 : i32
    %c0_i32_0 = arith.constant 0 : i32
    %c0_i32_1 = arith.constant 0 : i32
    return %c0_i32, %c0_i32_0 : i32, i32
  }
  func.func @transform_5(%arg0: i32) -> (i32, i32) {
    %c0_i32 = arith.constant 0 : i32
    %c0_i32_0 = arith.constant 0 : i32
    %c0_i32_1 = arith.constant 0 : i32
    return %c0_i32, %c0_i32_0 : i32, i32
  }
  func.func @transform_6(%arg0: i32) -> (i32, i32) {
    %c0_i32 = arith.constant 0 : i32
    %c0_i32_0 = arith.constant 0 : i32
    %c0_i32_1 = arith.constant 0 : i32
    return %c0_i32, %c0_i32_0 : i32, i32
  }
  func.func @transform_7(%arg0: i32) -> (i32, i32) {
    %c0_i32 = arith.constant 0 : i32
    %c0_i32_0 = arith.constant 0 : i32
    %c0_i32_1 = arith.constant 0 : i32
    return %c0_i32, %c0_i32_0 : i32, i32
  }
  func.func @transform_8(%arg0: i32) -> (i32, i32) {
    %c0_i32 = arith.constant 0 : i32
    %c0_i32_0 = arith.constant 0 : i32
    %c0_i32_1 = arith.constant 0 : i32
    return %c0_i32, %c0_i32_0 : i32, i32
  }
}

</mosaic_0001>

<bundles_post_ra>
// kernel: tpu_custom_call.1
= control target key start
LH: loop header
LB: loop body
LE: loop exit
PB: predicated region body
PF: predicated region fallthrough
CT: control target
= control target key end

     0   :  { %v2125_v7 = vmov 0   ;;  %vm225_vm0 = vcmask 392192   ;;  %s3379_s0 = inlined_call_operand.vmem [shape: f32[32,432], index: 0, kind: input, shape index: {}]   ;;  %s3380_s1 = inlined_call_operand.vmem [shape: f32[432,288], index: 1, kind: input, shape index: {}]   ;;  %s3381_s2 = inlined_call_operand.vmem [shape: f32[1,288], index: 2, kind: input, shape index: {}]   ;;  %s3382_s3 = inlined_call_operand.vmem [shape: f32[3,288,128], index: 3, kind: input, shape index: {}]   ;;  %s3383_s4 = inlined_call_operand.vmem [shape: f32[1,128], index: 4, kind: input, shape index: {}]   ;;  %s3384_s5 = inlined_call_operand.vmem [shape: f32[32,128], index: 5, kind: input, shape index: {}]   ;;  %s3385_s6 = inlined_call_operand.vmem [shape: f32[32,1], index: 6, kind: input, shape index: {}]   ;;  %s3386_s7 = inlined_call_operand.vmem [shape: f32[32,1], index: 7, kind: input, shape index: {}]   ;;  %s3387_s8 = inlined_call_operand.hbm [shape: f32[32,128], index: 8, kind: output, shape index: {}]  }
   0x1   :  { %v47_v0 = vld [vmem:[%s3380_s1 + $0x8] sm:$0xff]  ;;  %v50_v1 = vld [vmem:[%s3380_s1 + $0x20] sm:$0xff]  ;;  %v96_v2 = vld [vmem:[%s3380_s1 + $0x190] sm:$0xff]  ;;  %2099 = vset.pattern.permute.xlu0 %v2125_v7  ;;  %2100 = vset.pattern.permute.xlu1 %v2125_v7 }
   0x2   :  { %v1761_v3 = vpack.c.bf16 %v50_v1, %v47_v0  ;;  %v99_v4 = vld [vmem:[%s3380_s1 + $0x1a8] sm:$0xff]  ;;  %v46_v5 = vld [vmem:[%s3380_s1] sm:$0xff]  ;;  %v49_v6 = vld [vmem:[%s3380_s1 + $0x18] sm:$0xff] }
   0x3   :  { %v1869_v8 = vpack.c.bf16 %v99_v4, %v96_v2  ;;  %v1763_v9 = vpack.c.bf16 %v49_v6, %v46_v5  ;;  %v48_v10 = vld [vmem:[%s3380_s1 + $0x10] sm:$0xff]  ;;  %v51_v11 = vld [vmem:[%s3380_s1 + $0x28] sm:$0xff]  ;;  %v53_v12 = vld [vmem:[%s3380_s1 + $0x38] sm:$0xff] }
   0x4   :  { %1762 = vmatprep.subr.bf16.mxu0 %v1761_v3  ;;  %v1871_v13 = vpack.c.bf16 %v51_v11, %v48_v10  ;;  %v56_v14 = vld [vmem:[%s3380_s1 + $0x50] sm:$0xff]  ;;  %v102_v15 = vld [vmem:[%s3380_s1 + $0x1c0] sm:$0xff]  ;;  %v105_v16 = vld [vmem:[%s3380_s1 + $0x1d8] sm:$0xff] }
   0x5   :  { %1870 = vmatprep.subr.bf16.mxu1 %v1869_v8  ;;  %1764 = vmatpush1.bf16.msra.mxu0 %v1763_v9  ;;  %v1765_v17 = vpack.c.bf16 %v56_v14, %v53_v12  ;;  %v1873_v18 = vpack.c.bf16 %v105_v16, %v102_v15  ;;  %v52_v19 = vld [vmem:[%s3380_s1 + $0x30] sm:$0xff]  ;;  %v55_v20 = vld [vmem:[%s3380_s1 + $0x48] sm:$0xff]  ;;  %v54_v21 = vld [vmem:[%s3380_s1 + $0x40] sm:$0xff] }
   0x6   :  { %1872 = vmatpush3.bf16.msra.mxu1 %v1871_v13  ;;  %v1767_v22 = vpack.c.bf16 %v55_v20, %v52_v19  ;;  %v57_v23 = vld [vmem:[%s3380_s1 + $0x58] sm:$0xff]  ;;  %v59_v24 = vld [vmem:[%s3380_s1 + $0x68] sm:$0xff]  ;;  %v62_v25 = vld [vmem:[%s3380_s1 + $0x80] sm:$0xff] }
   0x7   :  { %1766 = vmatprep.subr.bf16.mxu0 %v1765_v17  ;;  %1874 = vmatprep.subr.bf16.mxu1 %v1873_v18  ;;  %v1875_v26 = vpack.c.bf16 %v57_v23, %v54_v21  ;;  %v1769_v27 = vpack.c.bf16 %v62_v25, %v59_v24  ;;  %v108_v28 = vld [vmem:[%s3380_s1 + $0x1f0] sm:$0xff]  ;;  %v111_v29 = vld [vmem:[%s3380_s1 + $0x208] sm:$0xff]  ;;  %v58_v30 = vld [vmem:[%s3380_s1 + $0x60] sm:$0xff] }
   0x8   :  { %v1877_v31 = vpack.c.bf16 %v111_v29, %v108_v28  ;;  %v61_v32 = vld [vmem:[%s3380_s1 + $0x78] sm:$0xff]  ;;  %v60_v33 = vld [vmem:[%s3380_s1 + $0x70] sm:$0xff]  ;;  %v63_v34 = vld [vmem:[%s3380_s1 + $0x88] sm:$0xff] }
   0x9   :  { %1768 = vmatpush1.bf16.msra.mxu0 %v1767_v22  ;;  %v1771_v35 = vpack.c.bf16 %v61_v32, %v58_v30  ;;  %v65_v36 = vld [vmem:[%s3380_s1 + $0x98] sm:$0xff]  ;;  %v68_v37 = vld [vmem:[%s3380_s1 + $0xb0] sm:$0xff]  ;;  %v114_v38 = vld [vmem:[%s3380_s1 + $0x220] sm:$0xff]  ;;  %v1879_v39 = vpack.c.bf16 %v63_v34, %v60_v33 }
   0xa   :  { %1876 = vmatpush3.bf16.msra.mxu1 %v1875_v26  ;;  %1770 = vmatprep.subr.bf16.mxu0 %v1769_v27  ;;  %v1773_v40 = vpack.c.bf16 %v68_v37, %v65_v36  ;;  %v117_v41 = vld [vmem:[%s3380_s1 + $0x238] sm:$0xff]  ;;  %v64_v42 = vld [vmem:[%s3380_s1 + $0x90] sm:$0xff]  ;;  %v67_v43 = vld [vmem:[%s3380_s1 + $0xa8] sm:$0xff] }
   0xb   :  { %1878 = vmatprep.subr.bf16.mxu1 %v1877_v31  ;;  %v1881_v44 = vpack.c.bf16 %v117_v41, %v114_v38  ;;  %v66_v45 = vld [vmem:[%s3380_s1 + $0xa0] sm:$0xff]  ;;  %v69_v46 = vld [vmem:[%s3380_s1 + $0xb8] sm:$0xff]  ;;  %v71_v47 = vld [vmem:[%s3380_s1 + $0xc8] sm:$0xff]  ;;  %v1775_v51 = vpack.c.bf16 %v67_v43, %v64_v42 }
   0xc   :  { %v74_v48 = vld [vmem:[%s3380_s1 + $0xe0] sm:$0xff]  ;;  %v120_v49 = vld [vmem:[%s3380_s1 + $0x250] sm:$0xff]  ;;  %v123_v50 = vld [vmem:[%s3380_s1 + $0x268] sm:$0xff]  ;;  %v1883_v52 = vpack.c.bf16 %v69_v46, %v66_v45 }
   0xd   :  { %1772 = vmatpush1.bf16.msra.mxu0 %v1771_v35  ;;  %v1777_v53 = vpack.c.bf16 %v74_v48, %v71_v47  ;;  %v70_v54 = vld [vmem:[%s3380_s1 + $0xc0] sm:$0xff]  ;;  %v73_v55 = vld [vmem:[%s3380_s1 + $0xd8] sm:$0xff]  ;;  %v72_v56 = vld [vmem:[%s3380_s1 + $0xd0] sm:$0xff]  ;;  %v1885_v57 = vpack.c.bf16 %v123_v50, %v120_v49  ;;  %v2126_v50 = vmov 0.0|0.0  }
   0xe   :  { %1880 = vmatpush3.bf16.msra.mxu1 %v1879_v39  ;;  %1774 = vmatprep.subr.bf16.mxu0 %v1773_v40  ;;  %v75_v58 = vld [vmem:[%s3380_s1 + $0xe8] sm:$0xff]  ;;  %v77_v59 = vld [vmem:[%s3380_s1 + $0xf8] sm:$0xff]  ;;  %v80_v60 = vld [vmem:[%s3380_s1 + $0x110] sm:$0xff]  ;;  %v1779_v63 = vpack.c.bf16 %v73_v55, %v70_v54 }
   0xf   :  { %1882 = vmatprep.subr.bf16.mxu1 %v1881_v44  ;;  %v126_v61 = vld [vmem:[%s3380_s1 + $0x280] sm:$0xff]  ;;  %v129_v62 = vld [vmem:[%s3380_s1 + $0x298] sm:$0xff]  ;;  %v1887_v0 = vpack.c.bf16 %v75_v58, %v72_v56  ;;  %v1781_v1 = vpack.c.bf16 %v80_v60, %v77_v59  ;;  %v76_v2 = vld [vmem:[%s3380_s1 + $0xf0] sm:$0xff] }
  0x10   :  { %v79_v3 = vld [vmem:[%s3380_s1 + $0x108] sm:$0xff]  ;;  %v78_v4 = vld [vmem:[%s3380_s1 + $0x100] sm:$0xff]  ;;  %v1889_v5 = vpack.c.bf16 %v129_v62, %v126_v61  ;;  %v81_v6 = vld [vmem:[%s3380_s1 + $0x118] sm:$0xff] }
  0x11   :  { %1776 = vmatpush1.bf16.msra.mxu0 %v1775_v51  ;;  %v83_v7 = vld [vmem:[%s3380_s1 + $0x128] sm:$0xff]  ;;  %v86_v8 = vld [vmem:[%s3380_s1 + $0x140] sm:$0xff]  ;;  %v132_v9 = vld [vmem:[%s3380_s1 + $0x2b0] sm:$0xff]  ;;  %v1783_v11 = vpack.c.bf16 %v79_v3, %v76_v2  ;;  %v1891_v13 = vpack.c.bf16 %v81_v6, %v78_v4 }
  0x12   :  { %1884 = vmatpush3.bf16.msra.mxu1 %v1883_v52  ;;  %1778 = vmatprep.subr.bf16.mxu0 %v1777_v53  ;;  %v135_v10 = vld [vmem:[%s3380_s1 + $0x2c8] sm:$0xff]  ;;  %v82_v12 = vld [vmem:[%s3380_s1 + $0x120] sm:$0xff]  ;;  %v1785_v14 = vpack.c.bf16 %v86_v8, %v83_v7  ;;  %v85_v15 = vld [vmem:[%s3380_s1 + $0x138] sm:$0xff] }
  0x13   :  { %1886 = vmatprep.subr.bf16.mxu1 %v1885_v57  ;;  %v84_v16 = vld [vmem:[%s3380_s1 + $0x130] sm:$0xff]  ;;  %v87_v17 = vld [vmem:[%s3380_s1 + $0x148] sm:$0xff]  ;;  %v1893_v18 = vpack.c.bf16 %v135_v10, %v132_v9  ;;  %v89_v19 = vld [vmem:[%s3380_s1 + $0x158] sm:$0xff]  ;;  %v1787_v24 = vpack.c.bf16 %v85_v15, %v82_v12 }
  0x14   :  { %v92_v20 = vld [vmem:[%s3380_s1 + $0x170] sm:$0xff]  ;;  %v31_v21 = vld [vmem:[%s3379_s0 + $0x8] sm:$0xff]  ;;  %v138_v22 = vld [vmem:[%s3380_s1 + $0x2e0] sm:$0xff]  ;;  %v1895_v25 = vpack.c.bf16 %v87_v17, %v84_v16 }
  0x15   :  { %1780 = vmatpush1.bf16.msra.mxu0 %v1779_v63  ;;  %v141_v23 = vld [vmem:[%s3380_s1 + $0x2f8] sm:$0xff]  ;;  %480 = vmatprep.mubr.f32.mxu1 %v31_v21  ;;  %v1789_v26 = vpack.c.bf16 %v92_v20, %v89_v19  ;;  %v88_v27 = vld [vmem:[%s3380_s1 + $0x150] sm:$0xff]  ;;  %v91_v28 = vld [vmem:[%s3380_s1 + $0x168] sm:$0xff] }
  0x16   :  { %1888 = vmatpush3.bf16.msra.mxu1 %v1887_v0  ;;  %1782 = vmatprep.subr.bf16.mxu0 %v1781_v1  ;;  %v90_v29 = vld [vmem:[%s3380_s1 + $0x160] sm:$0xff]  ;;  %v1897_v30 = vpack.c.bf16 %v141_v23, %v138_v22  ;;  %v93_v31 = vld [vmem:[%s3380_s1 + $0x178] sm:$0xff]  ;;  %v95_v32 = vld [vmem:[%s3380_s1 + $0x188] sm:$0xff]  ;;  %v1791_v34 = vpack.c.bf16 %v91_v28, %v88_v27 }
  0x17   :  { %1890 = vmatprep.subr.bf16.mxu1 %v1889_v5  ;;  %302 = vmatprep.mubr.f32.mxu0 %v31_v21  ;;  %v98_v33 = vld [vmem:[%s3380_s1 + $0x1a0] sm:$0xff]  ;;  %v1899_v35 = vpack.c.bf16 %v93_v31, %v90_v29  ;;  %v97_v38 = vld [vmem:[%s3380_s1 + $0x198] sm:$0xff]  ;;  %v144_v39 = vld [vmem:[%s3380_s1 + $0x310] sm:$0xff] }
  0x18   :  { %v1793_v36 = vpack.c.bf16 %v98_v33, %v95_v32  ;;  %v94_v37 = vld [vmem:[%s3380_s1 + $0x180] sm:$0xff]  ;;  %v147_v40 = vld [vmem:[%s3380_s1 + $0x328] sm:$0xff]  ;;  %v101_v41 = vld [vmem:[%s3380_s1 + $0x1b8] sm:$0xff] }
  0x19   :  { %1784 = vmatpush1.bf16.msra.mxu0 %v1783_v11  ;;  %v104_v42 = vld [vmem:[%s3380_s1 + $0x1d0] sm:$0xff]  ;;  %v1795_v43 = vpack.c.bf16 %v97_v38, %v94_v37  ;;  %v2397_v44 = vld [vmem:[%s3379_s0] sm:$0xff]  ;;  %v1902_v45 = vpack.c.bf16 %v147_v40, %v144_v39  ;;  %v103_v48 = vld [vmem:[%s3380_s1 + $0x1c8] sm:$0xff] }
  0x1a   :  { %1892 = vmatpush3.bf16.msra.mxu1 %v1891_v13  ;;  %1786 = vmatprep.subr.bf16.mxu0 %v1785_v14  ;;  %v1797_v46 = vpack.c.bf16 %v104_v42, %v101_v41  ;;  %v100_v47 = vld [vmem:[%s3380_s1 + $0x1b0] sm:$0xff]  ;;  %v150_v49 = vld [vmem:[%s3380_s1 + $0x340] sm:$0xff]  ;;  %v153_v51 = vld [vmem:[%s3380_s1 + $0x358] sm:$0xff] }
  0x1b   :  { %1894 = vmatprep.subr.bf16.mxu1 %v1893_v18  ;;  %v107_v52 = vld [vmem:[%s3380_s1 + $0x1e8] sm:$0xff]  ;;  %v110_v53 = vld [vmem:[%s3380_s1 + $0x200] sm:$0xff]  ;;  %v1799_v54 = vpack.c.bf16 %v103_v48, %v100_v47  ;;  %v1905_v56 = vpack.c.bf16 %v153_v51, %v150_v49  ;;  %v109_v58 = vld [vmem:[%s3380_s1 + $0x1f8] sm:$0xff] }
  0x1c   :  { %v106_v55 = vld [vmem:[%s3380_s1 + $0x1e0] sm:$0xff]  ;;  %v1801_v57 = vpack.c.bf16 %v110_v53, %v107_v52  ;;  %v156_v59 = vld [vmem:[%s3380_s1 + $0x370] sm:$0xff]  ;;  %v159_v60 = vld [vmem:[%s3380_s1 + $0x388] sm:$0xff] }
  0x1d   :  { %1788 = vmatpush1.bf16.msra.mxu0 %v1787_v24  ;;  %v113_v61 = vld [vmem:[%s3380_s1 + $0x218] sm:$0xff]  ;;  %v116_v62 = vld [vmem:[%s3380_s1 + $0x230] sm:$0xff]  ;;  %v2441_v63 = vld [vmem:[%s3379_s0 + $0x28] sm:$0xff]  ;;  %v1803_v1 = vpack.c.bf16 %v109_v58, %v106_v55  ;;  %v1908_v4 = vpack.c.bf16 %v159_v60, %v156_v59 }
  0x1e   :  { %1896 = vmatpush3.bf16.msra.mxu1 %v1895_v25  ;;  %1790 = vmatprep.subr.bf16.mxu0 %v1789_v26  ;;  %v2447_v0 = vld [vmem:[%s3379_s0 + $0x20] sm:$0xff]  ;;  %v112_v2 = vld [vmem:[%s3380_s1 + $0x210] sm:$0xff]  ;;  %v2456_v3 = vld [vmem:[%s3379_s0 + $0x48] sm:$0xff]  ;;  %v1805_v5 = vpack.c.bf16 %v116_v62, %v113_v61 }
  0x1f   :  { %1898 = vmatprep.subr.bf16.mxu1 %v1897_v30  ;;  %v115_v6 = vld [vmem:[%s3380_s1 + $0x228] sm:$0xff]  ;;  %v162_v7 = vld [vmem:[%s3380_s1 + $0x3a0] sm:$0xff]  ;;  %v165_v9 = vld [vmem:[%s3380_s1 + $0x3b8] sm:$0xff] }
  0x20   :  { %v2467_v8 = vld [vmem:[%s3379_s0 + $0x40] sm:$0xff]  ;;  %v119_v10 = vld [vmem:[%s3380_s1 + $0x248] sm:$0xff]  ;;  %v1807_v13 = vpack.c.bf16 %v115_v6, %v112_v2  ;;  %v1911_v15 = vpack.c.bf16 %v165_v9, %v162_v7  ;;  %v121_v17 = vld [vmem:[%s3380_s1 + $0x258] sm:$0xff] }
  0x21   :  { %1792 = vmatpush1.bf16.msra.mxu0 %v1791_v34  ;;  %v122_v11 = vld [vmem:[%s3380_s1 + $0x260] sm:$0xff]  ;;  %v2483_v12 = vld [vmem:[%s3379_s0 + $0x68] sm:$0xff]  ;;  %v168_v18 = vld [vmem:[%s3380_s1 + $0x3d0] sm:$0xff] }
  0x22   :  { %1900 = vmatpush3.bf16.msra.mxu1 %v1899_v35  ;;  %1794 = vmatprep.subr.bf16.mxu0 %v1793_v36  ;;  %v118_v14 = vld [vmem:[%s3380_s1 + $0x240] sm:$0xff]  ;;  %v1809_v16 = vpack.c.bf16 %v122_v11, %v119_v10  ;;  %v171_v20 = vld [vmem:[%s3380_s1 + $0x3e8] sm:$0xff]  ;;  %v125_v21 = vld [vmem:[%s3380_s1 + $0x278] sm:$0xff] }
  0x23   :  { %1901 = vmatprep.subr.bf16.mxu1 %v2126_v50  ;;  %v2498_v19 = vld [vmem:[%s3379_s0 + $0x60] sm:$0xff]  ;;  %v128_v22 = vld [vmem:[%s3380_s1 + $0x290] sm:$0xff]  ;;  %v2514_v23 = vld [vmem:[%s3379_s0 + $0x18] sm:$0xff]  ;;  %v1811_v24 = vpack.c.bf16 %v121_v17, %v118_v14  ;;  %v1914_v25 = vpack.c.bf16 %v171_v20, %v168_v18 }
  0x24   :  { %v1813_v26 = vpack.c.bf16 %v128_v22, %v125_v21  ;;  %v124_v27 = vld [vmem:[%s3380_s1 + $0x270] sm:$0xff]  ;;  %v127_v28 = vld [vmem:[%s3380_s1 + $0x288] sm:$0xff]  ;;  %v174_v29 = vld [vmem:[%s3380_s1 + $0x400] sm:$0xff] }
  0x25   :  { %1796 = vmatpush1.bf16.msra.mxu0 %v1795_v43  ;;  %481 = vmatmul.mubr.f32.vlgmr.msra.gmra.mrb[0].mxu1 %v2397_v44  ;;  %v177_v30 = vld [vmem:[%s3380_s1 + $0x418] sm:$0xff]  ;;  %v131_v31 = vld [vmem:[%s3380_s1 + $0x2a8] sm:$0xff]  ;;  %v134_v32 = vld [vmem:[%s3380_s1 + $0x2c0] sm:$0xff]  ;;  %v1815_v33 = vpack.c.bf16 %v127_v28, %v124_v27 }
  0x26   :  { %1903 = vmatpush1.bf16.msra.mxu1 %v1902_v45  ;;  %1798 = vmatprep.subr.bf16.mxu0 %v1797_v46  ;;  %v1917_v34 = vpack.c.bf16 %v177_v30, %v174_v29  ;;  %v1817_v35 = vpack.c.bf16 %v134_v32, %v131_v31  ;;  %v130_v36 = vld [vmem:[%s3380_s1 + $0x2a0] sm:$0xff]  ;;  %v133_v37 = vld [vmem:[%s3380_s1 + $0x2b8] sm:$0xff]  ;;  %v180_v38 = vld [vmem:[%s3380_s1 + $0x430] sm:$0xff] }
  0x27   :  { %1904 = vmatprep.subr.bf16.mxu1 %v2126_v50  ;;  %485 = vmatprep.mubr.f32.mxu1 %v2441_v63  ;;  %v183_v39 = vld [vmem:[%s3380_s1 + $0x448] sm:$0xff]  ;;  %v137_v40 = vld [vmem:[%s3380_s1 + $0x2d8] sm:$0xff]  ;;  %v140_v41 = vld [vmem:[%s3380_s1 + $0x2f0] sm:$0xff]  ;;  %v1819_v42 = vpack.c.bf16 %v133_v37, %v130_v36 }
  0x28   :  { %v1920_v43 = vpack.c.bf16 %v183_v39, %v180_v38  ;;  %v1821_v45 = vpack.c.bf16 %v140_v41, %v137_v40  ;;  %v136_v46 = vld [vmem:[%s3380_s1 + $0x2d0] sm:$0xff]  ;;  %v139_v47 = vld [vmem:[%s3380_s1 + $0x2e8] sm:$0xff]  ;;  %v186_v48 = vld [vmem:[%s3380_s1 + $0x460] sm:$0xff] }
  0x29   :  { %1800 = vmatpush1.bf16.msra.mxu0 %v1799_v54  ;;  %486 = vmatmul.mubr.f32.gmra.mrb[2].mxu1 %v2447_v0  ;;  %v189_v49 = vld [vmem:[%s3380_s1 + $0x478] sm:$0xff]  ;;  %v143_v51 = vld [vmem:[%s3380_s1 + $0x308] sm:$0xff]  ;;  %v146_v52 = vld [vmem:[%s3380_s1 + $0x320] sm:$0xff]  ;;  %v1823_v55 = vpack.c.bf16 %v139_v47, %v136_v46 }
  0x2a   :  { %1906 = vmatpush1.bf16.msra.mxu1 %v1905_v56  ;;  %1802 = vmatprep.subr.bf16.mxu0 %v1801_v57  ;;  %v625_v53 = vld [vmem:[%s3385_s6] sm:$0xff]  ;;  %v627_v54 = vld [vmem:[%s3385_s6 + $0x10] sm:$0xff]  ;;  %v145_v57 = vld [vmem:[%s3380_s1 + $0x318] sm:$0xff]  ;;  %v1923_v58 = vpack.c.bf16 %v189_v49, %v186_v48  ;;  %v1825_v59 = vpack.c.bf16 %v146_v52, %v143_v51 }
  0x2b   :  { %1907 = vmatprep.subr.bf16.mxu1 %v2126_v50  ;;  %490 = vmatprep.mubr.f32.mxu1 %v2456_v3  ;;  %v142_v56 = vld [vmem:[%s3380_s1 + $0x300] sm:$0xff]  ;;  %v192_v60 = vld [vmem:[%s3380_s1 + $0x490] sm:$0xff]  ;;  %v195_v61 = vld [vmem:[%s3380_s1 + $0x4a8] sm:$0xff] }
  0x2c   :  { %631 = vperm.xlu0 %2099, %v625_v53   ;;  %v626_v62 = vld [vmem:[%s3385_s6 + $0x8] sm:$0xff]  ;;  %v152_v2 = vld [vmem:[%s3380_s1 + $0x350] sm:$0xff]  ;;  %641 = vperm.xlu1 %2100, %v627_v54  }
  0x2d   :  { %1804 = vmatpush1.bf16.msra.mxu0 %v1803_v1  ;;  %491 = vmatmul.mubr.f32.gmra.mrb[4].mxu1 %v2467_v8  ;;  %v149_v1 = vld [vmem:[%s3380_s1 + $0x338] sm:$0xff] }
  0x2e   :  { %1909 = vmatpush1.bf16.msra.mxu1 %v1908_v4  ;;  %1806 = vmatprep.subr.bf16.mxu0 %v1805_v5 }
  0x2f   :  { %1910 = vmatprep.subr.bf16.mxu1 %v2126_v50  ;;  %495 = vmatprep.mubr.f32.mxu1 %v2483_v12 }
  0x31   :  { %1808 = vmatpush1.bf16.msra.mxu0 %v1807_v13  ;;  %496 = vmatmul.mubr.f32.gmra.mrb[6].mxu1 %v2498_v19 }
  0x32   :  { %1912 = vmatpush1.bf16.msra.mxu1 %v1911_v15  ;;  %1810 = vmatprep.subr.bf16.mxu0 %v1809_v16 }
  0x33   :  { %1913 = vmatprep.subr.bf16.mxu1 %v2126_v50  ;;  %1430 = vmatprep.mubr.msk.f32.mxu1 %vm225_vm0, %v2514_v23 }
  0x35   :  { %1812 = vmatpush1.bf16.msra.mxu0 %v1811_v24 }
  0x36   :  { %1915 = vmatpush1.bf16.msra.mxu1 %v1914_v25  ;;  %1814 = vmatprep.subr.bf16.mxu0 %v1813_v26 }
  0x37   :  { %1916 = vmatprep.subr.bf16.mxu1 %v2126_v50 }
  0x39   :  { %1816 = vmatpush1.bf16.msra.mxu0 %v1815_v33 }
  0x3a   :  { %1918 = vmatpush1.bf16.msra.mxu1 %v1917_v34  ;;  %1818 = vmatprep.subr.bf16.mxu0 %v1817_v35 }
  0x3b   :  { %1919 = vmatprep.subr.bf16.mxu1 %v2126_v50 }
  0x3d   :  { %1820 = vmatpush1.bf16.msra.mxu0 %v1819_v42 }
  0x3e   :  { %1921 = vmatpush1.bf16.msra.mxu1 %v1920_v43  ;;  %1822 = vmatprep.subr.bf16.mxu0 %v1821_v45 }
  0x3f   :  { %1922 = vmatprep.subr.bf16.mxu1 %v2126_v50 }
  0x40   :  { %13 = vsyncpa [#allocation3], 0  ;;  %v628_v4 = vld [vmem:[%s3385_s6 + $0x18] sm:$0xff]  ;;  %v1827_v5 = vpack.c.bf16 %v145_v57, %v142_v56  ;;  %636 = vperm.xlu0 %2099, %v626_v62   ;;  %v1926_v6 = vpack.c.bf16 %v195_v61, %v192_v60  ;;  %v1829_v7 = vpack.c.bf16 %v152_v2, %v149_v1  ;;  %v148_v9 = vld [vmem:[%s3380_s1 + $0x330] sm:$0xff]  ;;  %vm795_vm3 = vcmask 261120   ;;  %s2127_s25 = smov [#allocation2]  }
  0x41   :  { %1824 = vmatpush1.bf16.msra.mxu0 %v1823_v55  ;;  %v151_v10 = vld [vmem:[%s3380_s1 + $0x348] sm:$0xff]  ;;  %v198_v11 = vld [vmem:[%s3380_s1 + $0x4c0] sm:$0xff]  ;;  %v201_v13 = vld [vmem:[%s3380_s1 + $0x4d8] sm:$0xff]  ;;  %646 = vperm.xlu1 %2100, %v628_v4   ;;  %s1415_s26 = sshll.u32 %s2127_s25, 4  ;;  %s1416_s26 = int_to_ptr.vmem [resolvable:$true] %s1415_s26 }
  0x42   :  { %1924 = vmatpush1.bf16.msra.mxu1 %v1923_v58  ;;  %1826 = vmatprep.subr.bf16.mxu0 %v1825_v59  ;;  %v155_v14 = vld [vmem:[%s3380_s1 + $0x368] sm:$0xff]  ;;  %v158_v15 = vld [vmem:[%s3380_s1 + $0x380] sm:$0xff]  ;;  %v1831_v17 = vpack.c.bf16 %v151_v10, %v148_v9  ;;  %v1929_v20 = vpack.c.bf16 %v201_v13, %v198_v11  ;;  %v157_v22 = vld [vmem:[%s3380_s1 + $0x378] sm:$0xff]  ;;  %s2101_s27 = scalar_lea.vmem %s1416_s26, 512  ;;  %p2106_p1 = scmp.lt.s32.totalorder %s1416_s26, %s1416_s26 }
  0x43   :  { %1925 = vmatprep.subr.bf16.mxu1 %v2126_v50  ;;  %v686_v16 = vld [vmem:[%s3386_s7] sm:$0xff]  ;;  %v687_v18 = vld [vmem:[%s3386_s7 + $0x8] sm:$0xff]  ;;  %v1833_v21 = vpack.c.bf16 %v158_v15, %v155_v14  ;;  %v161_v25 = vld [vmem:[%s3380_s1 + $0x398] sm:$0xff]  ;;  %p2102_p0 = scmp.ne.s32.totalorder %s1416_s26, %s2101_s27  ;;  %p2107_p2 = scmp.lt.s32.totalorder %s2101_s27, %s2101_s27 }
  0x44   :  { %303 = vmatmul.mubr.f32.vlgmr.msra.gmra.mrb[0].mxu0 %v2397_v44  ;;  %v154_v44 = vld [vmem:[%s3380_s1 + $0x360] sm:$0xff]  ;;  %v207_v24 = vld [vmem:[%s3380_s1 + $0x508] sm:$0xff]  ;;  %v164_v26 = vld [vmem:[%s3380_s1 + $0x3b0] sm:$0xff]  ;;  %692 = vperm.xlu0 %2099, %v686_v16  }
  0x45   :  { %1828 = vmatpush1.bf16.msra.mxu0 %v1827_v5  ;;  %308 = vmatprep.mubr.f32.mxu0 %v2441_v63  ;;  %v204_v63 = vld [vmem:[%s3380_s1 + $0x4f0] sm:$0xff]  ;;  %v1835_v28 = vpack.c.bf16 %v157_v22, %v154_v44  ;;  %v689_v29 = vld [vmem:[%s3386_s7 + $0x18] sm:$0xff]  ;;  %v1837_v31 = vpack.c.bf16 %v164_v26, %v161_v25  ;;  %v163_v32 = vld [vmem:[%s3380_s1 + $0x3a8] sm:$0xff]  ;;  %p2108_p3 = por %p2107_p2, %p2106_p1 }
  0x46   :  { %1927 = vmatpush1.bf16.msra.mxu1 %v1926_v6  ;;  %1830 = vmatprep.subr.bf16.mxu0 %v1829_v7  ;;  %v688_v27 = vld [vmem:[%s3386_s7 + $0x10] sm:$0xff]  ;;  %v1932_v30 = vpack.c.bf16 %v207_v24, %v204_v63  ;;  %v170_v33 = vld [vmem:[%s3380_s1 + $0x3e0] sm:$0xff]  ;;  %v173_v37 = vld [vmem:[%s3380_s1 + $0x3f8] sm:$0xff] }
  0x47   :  { %1928 = vmatprep.subr.bf16.mxu1 %v2126_v50  ;;  %697 = vperm.xlu1 %2100, %v687_v18   ;;  %v166_v36 = vld [vmem:[%s3380_s1 + $0x3c0] sm:$0xff]  ;;  %v176_v38 = vld [vmem:[%s3380_s1 + $0x410] sm:$0xff]  ;;  %v41_v43 = vld [vmem:[%s3379_s0 + $0x58] sm:$0xff]  ;;  %p2109_p4 = pnand %p2108_p3, %p2102_p0 }
  0x48   :  { %309 = vmatmul.mubr.f32.gmra.mrb[2].mxu0 %v2447_v0  ;;  %v160_v0 = vld [vmem:[%s3380_s1 + $0x390] sm:$0xff]  ;;  %702 = vperm.xlu0 %2099, %v688_v27   ;;  %v1845_v41 = vpack.c.bf16 %v176_v38, %v173_v37  ;;  %v179_v45 = vld [vmem:[%s3380_s1 + $0x428] sm:$0xff]  ;;  %v182_v46 = vld [vmem:[%s3380_s1 + $0x440] sm:$0xff] }
  0x49   :  { %1832 = vmatpush1.bf16.msra.mxu0 %v1831_v17  ;;  %314 = vmatprep.mubr.f32.mxu0 %v2456_v3  ;;  %v167_v3 = vld [vmem:[%s3380_s1 + $0x3c8] sm:$0xff]  ;;  %v1839_v34 = vpack.c.bf16 %v163_v32, %v160_v0  ;;  %v36_v40 = vld [vmem:[%s3379_s0 + $0x30] sm:$0xff]  ;;  %v1849_v49 = vpack.c.bf16 %v182_v46, %v179_v45  ;;  %v178_v51 = vld [vmem:[%s3380_s1 + $0x420] sm:$0xff] }
  0x4a   :  { %1930 = vmatpush1.bf16.msra.mxu1 %v1929_v20  ;;  %1834 = vmatprep.subr.bf16.mxu0 %v1833_v21  ;;  %v1841_v35 = vpack.c.bf16 %v170_v33, %v167_v3  ;;  %v172_v42 = vld [vmem:[%s3380_s1 + $0x3f0] sm:$0xff]  ;;  %v181_v52 = vld [vmem:[%s3380_s1 + $0x438] sm:$0xff]  ;;  %v187_v59 = vld [vmem:[%s3380_s1 + $0x468] sm:$0xff] }
  0x4b   :  { %1931 = vmatprep.subr.bf16.mxu1 %v2126_v50  ;;  %707 = vperm.xlu1 %2100, %v689_v29   ;;  %v2679_v50 = vld [vmem:[%s3379_s0 + $0x10] sm:$0xff]  ;;  %v185_v53 = vld [vmem:[%s3380_s1 + $0x458] sm:$0xff]  ;;  %v1851_v55 = vpack.c.bf16 %v181_v52, %v178_v51  ;;  %v191_v60 = vld [vmem:[%s3380_s1 + $0x488] sm:$0xff] }
  0x4c   :  { %315 = vmatmul.mubr.f32.gmra.mrb[4].mxu0 %v2467_v8  ;;  %v169_v8 = vld [vmem:[%s3380_s1 + $0x3d8] sm:$0xff]  ;;  %v40_v48 = vld [vmem:[%s3379_s0 + $0x50] sm:$0xff]  ;;  %v194_v61 = vld [vmem:[%s3380_s1 + $0x4a0] sm:$0xff] }
  0x4d   :  { %1836 = vmatpush1.bf16.msra.mxu0 %v1835_v28  ;;  %320 = vmatprep.mubr.f32.mxu0 %v2483_v12  ;;  %v2690_v12 = vld [vmem:[%s3379_s0 + $0x38] sm:$0xff]  ;;  %v1843_v39 = vpack.c.bf16 %v169_v8, %v166_v36  ;;  %v188_v54 = vld [vmem:[%s3380_s1 + $0x470] sm:$0xff]  ;;  %v1857_v1 = vpack.c.bf16 %v194_v61, %v191_v60  ;;  %v190_v2 = vld [vmem:[%s3380_s1 + $0x480] sm:$0xff] }
  0x4e   :  { %1933 = vmatpush1.bf16.msra.mxu1 %v1932_v30  ;;  %1838 = vmatprep.subr.bf16.mxu0 %v1837_v31  ;;  %v44_v56 = vld [vmem:[%s3379_s0 + $0x70] sm:$0xff]  ;;  %v1853_v57 = vpack.c.bf16 %v188_v54, %v185_v53  ;;  %v193_v4 = vld [vmem:[%s3380_s1 + $0x498] sm:$0xff]  ;;  %v199_v11 = vld [vmem:[%s3380_s1 + $0x4c8] sm:$0xff] }
  0x4f   :  { %v184_v58 = vld [vmem:[%s3380_s1 + $0x450] sm:$0xff]  ;;  %v197_v5 = vld [vmem:[%s3380_s1 + $0x4b8] sm:$0xff]  ;;  %v1859_v7 = vpack.c.bf16 %v193_v4, %v190_v2  ;;  %v203_v13 = vld [vmem:[%s3380_s1 + $0x4e8] sm:$0xff] }
  0x50   :  { %321 = vmatmul.mubr.f32.gmra.mrb[6].mxu0 %v2498_v19  ;;  %v175_v19 = vld [vmem:[%s3380_s1 + $0x408] sm:$0xff]  ;;  %v1855_v62 = vpack.c.bf16 %v187_v59, %v184_v58  ;;  %v200_v6 = vld [vmem:[%s3380_s1 + $0x4d0] sm:$0xff]  ;;  %v206_v14 = vld [vmem:[%s3380_s1 + $0x500] sm:$0xff] }
  0x51   :  { %566 = vmatmul.mubr.f32.vlgmr.msra.gmra.mrb[8].mxu1 %v2679_v50  ;;  %1840 = vmatpush1.bf16.msra.mxu0 %v1839_v34  ;;  %v1847_v47 = vpack.c.bf16 %v175_v19, %v172_v42  ;;  %v1861_v9 = vpack.c.bf16 %v200_v6, %v197_v5  ;;  %v196_v10 = vld [vmem:[%s3380_s1 + $0x4b0] sm:$0xff]  ;;  %v1865_v16 = vpack.c.bf16 %v206_v14, %v203_v13  ;;  %v202_v17 = vld [vmem:[%s3380_s1 + $0x4e0] sm:$0xff]  ;;  %v205_v18 = vld [vmem:[%s3380_s1 + $0x4f8] sm:$0xff] }
  0x52   :  { %1431 = vmatprep.mubr.msk.f32.mxu1 %vm225_vm0, %v2690_v12  ;;  %1842 = vmatprep.subr.bf16.mxu0 %v1841_v35  ;;  %v1863_v15 = vpack.c.bf16 %v199_v11, %v196_v10  ;;  %v1867_v20 = vpack.c.bf16 %v205_v18, %v202_v17  ;;  %v1450_v21 = vld [vmem:[%s3382_s3 + $0x1a0] sm:$0xff]  ;;  %v1451_v44 = vld [vmem:[%s3382_s3 + $0x1a8] sm:$0xff]  ;;  %v1452_v26 = vld [vmem:[%s3382_s3 + $0x1b0] sm:$0xff] }
  0x53   :  { %1426 = vmatprep.mubr.msk.f32.mxu0 %vm225_vm0, %v2514_v23  ;;  %v45_v23 = vld [vmem:[%s3379_s0 + $0x78] sm:$0xff]  ;;  %v1934_v22 = vpack.c.bf16 %v1451_v44, %v1450_v21  ;;  %v1434_v63 = vld [vmem:[%s3382_s3 + $0x120] sm:$0xff]  ;;  %v1435_v24 = vld [vmem:[%s3382_s3 + $0x128] sm:$0xff] }
  0x54   :  { %v1936_v25 = vpack.c.bf16 %v1435_v24, %v1434_v63  ;;  %v1453_v27 = vld [vmem:[%s3382_s3 + $0x1b8] sm:$0xff]  ;;  %v1436_v29 = vld [vmem:[%s3382_s3 + $0x130] sm:$0xff]  ;;  %v754_v0 = vld [vmem:[%s3382_s3 + $0x100] sm:$0xff] }
  0x55   :  { %571 = vmatmul.mubr.f32.gmra.mrb[10].mxu1 %v36_v40  ;;  %1844 = vmatpush1.bf16.msra.mxu0 %v1843_v39  ;;  %v1938_v28 = vpack.c.bf16 %v1453_v27, %v1452_v26  ;;  %v1437_v30 = vld [vmem:[%s3382_s3 + $0x138] sm:$0xff]  ;;  %v755_v32 = vld [vmem:[%s3382_s3 + $0x108] sm:$0xff]  ;;  %v1454_v3 = vld [vmem:[%s3382_s3 + $0x1c0] sm:$0xff] }
  0x56   :  { %1432 = vmatprep.mubr.msk.f32.mxu1 %vm225_vm0, %v41_v43  ;;  %1846 = vmatprep.subr.bf16.mxu0 %v1845_v41  ;;  %v1940_v31 = vpack.c.bf16 %v1437_v30, %v1436_v29  ;;  %v1455_v33 = vld [vmem:[%s3382_s3 + $0x1c8] sm:$0xff]  ;;  %v2006_v34 = vpack.c.bf16 %v755_v32, %v754_v0  ;;  %v1438_v35 = vld [vmem:[%s3382_s3 + $0x140] sm:$0xff]  ;;  %v757_v37 = vld [vmem:[%s3382_s3 + $0x118] sm:$0xff] }
  0x57   :  { %1935 = vmatprep.subr.bf16.mxu1 %v1934_v22  ;;  %v1439_v36 = vld [vmem:[%s3382_s3 + $0x148] sm:$0xff]  ;;  %v1456_v38 = vld [vmem:[%s3382_s3 + $0x1d0] sm:$0xff]  ;;  %v1457_v39 = vld [vmem:[%s3382_s3 + $0x1d8] sm:$0xff] }
  0x58   :  { %1937 = vmatpush3.bf16.msra.mxu1 %v1936_v25  ;;  %v1944_v8 = vpack.c.bf16 %v1439_v36, %v1438_v35  ;;  %v1946_v41 = vpack.c.bf16 %v1457_v39, %v1456_v38  ;;  %v1440_v42 = vld [vmem:[%s3382_s3 + $0x150] sm:$0xff]  ;;  %v1441_v19 = vld [vmem:[%s3382_s3 + $0x158] sm:$0xff]  ;;  %v1494_v45 = vld [vmem:[%s3382_s3 + $0x2c0] sm:$0xff] }
  0x59   :  { %576 = vmatmul.mubr.f32.gmra.mrb[12].mxu1 %v40_v48  ;;  %1848 = vmatpush1.bf16.msra.mxu0 %v1847_v47  ;;  %v1495_v46 = vld [vmem:[%s3382_s3 + $0x2c8] sm:$0xff]  ;;  %v1458_v47 = vld [vmem:[%s3382_s3 + $0x1e0] sm:$0xff]  ;;  %v1460_v54 = vld [vmem:[%s3382_s3 + $0x1f0] sm:$0xff] }
  0x5a   :  { %1433 = vmatprep.mubr.msk.f32.mxu1 %vm225_vm0, %v45_v23  ;;  %1850 = vmatprep.subr.bf16.mxu0 %v1849_v49  ;;  %v2014_v49 = vpack.c.bf16 %v1495_v46, %v1494_v45  ;;  %v1442_v52 = vld [vmem:[%s3382_s3 + $0x160] sm:$0xff]  ;;  %v1445_v58 = vld [vmem:[%s3382_s3 + $0x178] sm:$0xff]  ;;  %v1463_v61 = vld [vmem:[%s3382_s3 + $0x208] sm:$0xff] }
  0x5b   :  { %1939 = vmatprep.subr.bf16.mxu1 %v1938_v28  ;;  %v1462_v60 = vld [vmem:[%s3382_s3 + $0x200] sm:$0xff]  ;;  %v1447_v2 = vld [vmem:[%s3382_s3 + $0x188] sm:$0xff]  ;;  %v1464_v5 = vld [vmem:[%s3382_s3 + $0x210] sm:$0xff]  ;;  %v210_v28 = vlaneseq }
  0x5c   :  { %1941 = vmatpush3.bf16.msra.mxu1 %v1940_v31  ;;  %v1465_v6 = vld [vmem:[%s3382_s3 + $0x218] sm:$0xff]  ;;  %v1466_v13 = vld [vmem:[%s3382_s3 + $0x220] sm:$0xff]  ;;  %v1467_v14 = vld [vmem:[%s3382_s3 + $0x228] sm:$0xff] }
  0x5d   :  { %581 = vmatmul.mubr.f32.gmra.mrb[14].mxu1 %v44_v56  ;;  %1852 = vmatpush1.bf16.msra.mxu0 %v1851_v55  ;;  %v1461_v55 = vld [vmem:[%s3382_s3 + $0x1f8] sm:$0xff]  ;;  %v2915_v29 = vshrl.u32 %v210_v28, 7  ;;  %v2921_v31 = vld [vmem:[%s3381_s2] sm:$0x7]  ;;  %v1483_v28 = vld [vmem:[%s3382_s3 + $0x268] sm:$0xff] }
  0x5e   :  { %1854 = vmatprep.subr.bf16.mxu0 %v1853_v57  ;;  %v1444_v57 = vld [vmem:[%s3382_s3 + $0x170] sm:$0xff]  ;;  %v1449_v10 = vld [vmem:[%s3382_s3 + $0x198] sm:$0xff] }
  0x5f   :  { %v1956_v59 = vpack.c.bf16 %v1445_v58, %v1444_v57  ;;  %v220_v30 = vsub.s32 2, %v2915_v29  ;;  %vm612_vm1 = vcmp.lt.s32.totalorder %v2915_v29, 1  ;;  %vm673_vm2 = vcmp.lt.s32.totalorder %v2915_v29, 7 }
  0x61   :  { %1856 = vmatpush1.bf16.msra.mxu0 %v1855_v62  ;;  %v1958_v62 = vpack.c.bf16 %v1463_v61, %v1462_v60  ;;  %v221_v0 = vrot.slane %v2921_v31, %v220_v30  ;;  %v216_v30 = vsub.s32 1, %v2915_v29 }
  0x62   :  { %1858 = vmatprep.subr.bf16.mxu0 %v1857_v1  ;;  %v1446_v1 = vld [vmem:[%s3382_s3 + $0x180] sm:$0xff] }
  0x63   :  { %v1960_v4 = vpack.c.bf16 %v1447_v2, %v1446_v1  ;;  %v1479_v1 = vld [vmem:[%s3382_s3 + $0x248] sm:$0xff]  ;;  %v1496_v2 = vld [vmem:[%s3382_s3 + $0x2d0] sm:$0xff] }
  0x65   :  { %1860 = vmatpush1.bf16.msra.mxu0 %v1859_v7  ;;  %v1962_v7 = vpack.c.bf16 %v1465_v6, %v1464_v5 }
  0x66   :  { %1862 = vmatprep.subr.bf16.mxu0 %v1861_v9  ;;  %v1448_v9 = vld [vmem:[%s3382_s3 + $0x190] sm:$0xff] }
  0x67   :  { %v1964_v11 = vpack.c.bf16 %v1449_v10, %v1448_v9 }
  0x69   :  { %1864 = vmatpush1.bf16.msra.mxu0 %v1863_v15  ;;  %v2912_v15 = vpack.c.bf16 %v1467_v14, %v1466_v13 }
  0x6a   :  { %1866 = vmatprep.subr.bf16.mxu0 %v1865_v16 }
  0x6d   :  { %1868 = vmatpush1.bf16.msra.mxu0 %v1867_v20 }
  0x6e   :  { %2007 = vmatprep.subr.bf16.mxu0 %v2006_v34 }
  0x70   :  { %392 = vmatmul.mubr.f32.vlgmr.msra.gmra.mrb[0].mxu0 %v2679_v50  ;;  %v1942_v50 = vpack.c.bf16 %v1455_v33, %v1454_v3 }
  0x71   :  { %1427 = vmatprep.mubr.msk.f32.mxu0 %vm225_vm0, %v2690_v12  ;;  %2009 = vmatpush3.bf16.msra.mxu0 %v2006_v34  ;;  %v756_v12 = vld [vmem:[%s3382_s3 + $0x110] sm:$0xff] }
  0x72   :  { %1943 = vmatprep.subr.bf16.mxu1 %v1942_v50 }
  0x73   :  { %1945 = vmatpush3.bf16.msra.mxu1 %v1944_v8 }
  0x74   :  { %398 = vmatmul.mubr.f32.gmra.mrb[2].mxu0 %v36_v40  ;;  %v2010_v40 = vpack.c.bf16 %v757_v37, %v756_v12  ;;  %1947 = vmatprep.subr.bf16.mxu1 %v1946_v41 }
  0x75   :  { %1428 = vmatprep.mubr.msk.f32.mxu0 %vm225_vm0, %v41_v43  ;;  %v1948_v43 = vpack.c.bf16 %v1441_v19, %v1440_v42 }
  0x76   :  { %2011 = vmatprep.subr.bf16.mxu0 %v2010_v40 }
  0x77   :  { %2013 = vmatpush3.bf16.msra.mxu0 %v2010_v40  ;;  %1949 = vmatpush3.bf16.msra.mxu1 %v1948_v43 }
  0x78   :  { %404 = vmatmul.mubr.f32.gmra.mrb[4].mxu0 %v40_v48  ;;  %v1459_v48 = vld [vmem:[%s3382_s3 + $0x1e8] sm:$0xff]  ;;  %2015 = vmatprep.subr.bf16.mxu0 %v2014_v49 }
  0x79   :  { %1429 = vmatprep.mubr.msk.f32.mxu0 %vm225_vm0, %v45_v23  ;;  %v1950_v51 = vpack.c.bf16 %v1459_v48, %v1458_v47  ;;  %v1443_v23 = vld [vmem:[%s3382_s3 + $0x168] sm:$0xff] }
  0x7a   :  { %v1952_v53 = vpack.c.bf16 %v1443_v23, %v1442_v52 }
  0x7b   :  { %1951 = vmatprep.subr.bf16.mxu1 %v1950_v51 }
  0x7c   :  { %410 = vmatmul.mubr.f32.gmra.mrb[6].mxu0 %v44_v56  ;;  %1953 = vmatpush3.bf16.msra.mxu1 %v1952_v53  ;;  %v1954_v56 = vpack.c.bf16 %v1461_v55, %v1460_v54 }
  0x7e   :  { %1955 = vmatprep.subr.bf16.mxu1 %v1954_v56 }
  0x80   :  { %1957 = vmatpush3.bf16.msra.mxu1 %v1956_v59 }
  0x81   :  { %1959 = vmatprep.subr.bf16.mxu1 %v1958_v62  ;;  %v1478_v62 = vld [vmem:[%s3382_s3 + $0x240] sm:$0xff] }
  0x82   :  { %v2016_v13 = vpack.c.bf16 %v1479_v1, %v1478_v62  ;;  %v1507_v62 = vld [vmem:[%s3382_s3 + $0x328] sm:$0xff] }
  0x84   :  { %1961 = vmatpush3.bf16.msra.mxu1 %v1960_v4  ;;  %v1497_v4 = vld [vmem:[%s3382_s3 + $0x2d8] sm:$0xff] }
  0x85   :  { %1963 = vmatprep.subr.bf16.mxu1 %v1962_v7 }
  0x88   :  { %1965 = vmatpush3.bf16.msra.mxu1 %v1964_v11 }
  0x89   :  { %1967 = vmatprep.subr.bf16.mxu1 %v2912_v15 }
  0xab   :  { %v2944_v55 = vpop.permute.xlu0 %631  ;;  %v2954_v59 = vpop.permute.xlu1 %641 }
  0xbf   :  { %v2982_v10 = vpop.permute.xlu0 %636 }
  0xf8   :  { %v1551_v16 = vpop.f32.mrb[0].mxu1 }
  0xf9   :  { %v1552_v17 = vpop.f32.mrb[1].mxu1 }
  0xfa   :  { %v1553_v18 = vadd.f32 %v1552_v17, %v1551_v16  ;;  %v2018_v17 = vpack.c.bf16 %v1497_v4, %v1496_v2 }
  0xfc   :  { %v1554_v20 = vpop.f32.mrb[2].mxu1  ;;  %v483_v32 = vadd.f32 %v1553_v18, %v221_v0  ;;  %v1480_v18 = vld [vmem:[%s3382_s3 + $0x250] sm:$0xff] }
  0xfd   :  { %v1555_v21 = vpop.f32.mrb[3].mxu1 }
  0xfe   :  { %v1556_v44 = vadd.f32 %v1555_v21, %v1554_v20  ;;  %v1481_v20 = vld [vmem:[%s3382_s3 + $0x258] sm:$0xff]  ;;  %v2993_v21 = vpop.permute.xlu1 %646 }
 0x100   :  { %v1557_v22 = vpop.f32.mrb[4].mxu1  ;;  %v488_v50 = vadd.f32 %v1556_v44, %v221_v0  ;;  %v1498_v44 = vld [vmem:[%s3382_s3 + $0x2e0] sm:$0xff] }
 0x101   :  { %v1558_v63 = vpop.f32.mrb[5].mxu1 }
 0x102   :  { %v1559_v24 = vadd.f32 %v1558_v63, %v1557_v22  ;;  %v1499_v22 = vld [vmem:[%s3382_s3 + $0x2e8] sm:$0xff] }
 0x104   :  { %v1560_v25 = vpop.f32.mrb[6].mxu1  ;;  %v493_v37 = vadd.f32 %v1559_v24, %v221_v0  ;;  %v2020_v24 = vpack.c.bf16 %v1481_v20, %v1480_v18 }
 0x105   :  { %v1561_v26 = vpop.f32.mrb[7].mxu1 }
 0x106   :  { %v1562_v27 = vadd.f32 %v1561_v26, %v1560_v25  ;;  %v212_v25 = vsub.s32 0, %v2915_v29  ;;  %v2022_v26 = vpack.c.bf16 %v1499_v22, %v1498_v44 }
 0x108   :  { %v498_v41 = vadd.f32 %v1562_v27, %v221_v0  ;;  %v1482_v27 = vld [vmem:[%s3382_s3 + $0x260] sm:$0xff]  ;;  %v1500_v0 = vld [vmem:[%s3382_s3 + $0x2f0] sm:$0xff] }
 0x124   :  { %v567_v3 = vpop.f32.mrb[8].mxu1 }
 0x125   :  { %v568_v33 = vadd.f32 %v567_v3, %v483_v32  ;;  %v569_v34 = vpop.f32.mrb[9].mxu1  ;;  %v1501_v32 = vld [vmem:[%s3382_s3 + $0x2f8] sm:$0xff]  ;;  %v2024_v3 = vpack.c.bf16 %v1483_v28, %v1482_v27 }
 0x126   :  { %v3024_v34 = vrot.slane %v2921_v31, %v216_v30 }
 0x127   :  { %v2924_v35 = vmax.f32 %v568_v33, 0.0  ;;  %v3021_v33 = vrot.slane %v2921_v31, %v212_v25 }
 0x128   :  { %v572_v36 = vpop.f32.mrb[10].mxu1 }
 0x129   :  { %v573_v8 = vadd.f32 %v572_v36, %v488_v50  ;;  %v574_v12 = vpop.f32.mrb[11].mxu1  ;;  %v600_v39 = vrot.slane %v2924_v35, 7  ;;  %v663_v42 = vrot.slane %v2924_v35, 1  ;;  %v2026_v50 = vpack.c.bf16 %v1501_v32, %v1500_v0  ;;  %v1484_v36 = vld [vmem:[%s3382_s3 + $0x270] sm:$0xff]  ;;  %v1490_v0 = vld [vmem:[%s3382_s3 + $0x2a0] sm:$0xff]  ;;  %v1491_v32 = vld [vmem:[%s3382_s3 + $0x2a8] sm:$0xff] }
 0x12a   :  { %v1502_v12 = vld [vmem:[%s3382_s3 + $0x300] sm:$0xff] }
 0x12b   :  { %v2926_v38 = vmax.f32 %v573_v8, 0.0  ;;  %v1485_v8 = vld [vmem:[%s3382_s3 + $0x278] sm:$0xff] }
 0x12c   :  { %v577_v40 = vpop.f32.mrb[12].mxu1 }
 0x12d   :  { %v603_v19 = vrot.slane %v2926_v38, 7  ;;  %v666_v43 = vrot.slane %v2926_v38, 1  ;;  %v578_v45 = vadd.f32 %v577_v40, %v493_v37  ;;  %v579_v46 = vpop.f32.mrb[13].mxu1  ;;  %v1503_v37 = vld [vmem:[%s3382_s3 + $0x308] sm:$0xff] }
 0x12e   :  { %v1468_v46 = vld [vmem:[%s3382_s3 + $0x230] sm:$0xff] }
 0x12f   :  { %v621_v47 = vsel %vm612_vm1, %v600_v39, %v603_v19  ;;  %v2936_v48 = vmax.f32 %v578_v45, 0.0  ;;  %v2940_v49 = vsel %vm673_vm2, %v663_v42, %v666_v43  ;;  %v1487_v45 = vld [vmem:[%s3382_s3 + $0x288] sm:$0xff] }
 0x130   :  { %v582_v51 = vpop.f32.mrb[14].mxu1  ;;  %v654_v16 = vmul.f32 %v2982_v10, %v621_v47  ;;  %v1469_v47 = vld [vmem:[%s3382_s3 + $0x238] sm:$0xff] }
 0x131   :  { %v606_v52 = vrot.slane %v2936_v48, 7  ;;  %v669_v23 = vrot.slane %v2936_v48, 1  ;;  %v583_v53 = vadd.f32 %v582_v51, %v498_v41  ;;  %v584_v54 = vpop.f32.mrb[15].mxu1  ;;  %v2028_v41 = vpack.c.bf16 %v1485_v8, %v1484_v36  ;;  %v1504_v51 = vld [vmem:[%s3382_s3 + $0x310] sm:$0xff] }
 0x133   :  { %v2946_v56 = vmax.f32 %v583_v53, 0.0  ;;  %v2950_v57 = vsel %vm673_vm2, %v666_v43, %v669_v23  ;;  %v618_v58 = vsel %vm612_vm1, %v603_v19, %v606_v52  ;;  %v2030_v43 = vpack.c.bf16 %v1503_v37, %v1502_v12  ;;  %v1508_v37 = vld [vmem:[%s3382_s3 + $0x330] sm:$0xff] }
 0x134   :  { %v657_v14 = vmul.f32 %v2954_v59, %v618_v58 }
 0x135   :  { %v609_v60 = vrot.slane %v2946_v56, 7  ;;  %v672_v61 = vrot.slane %v2946_v56, 1 }
 0x137   :  { %v2972_v5 = vsel %vm673_vm2, %v672_v61, %v663_v42  ;;  %v624_v6 = vsel %vm612_vm1, %v609_v60, %v600_v39  ;;  %v2978_v7 = vsel %vm673_vm2, %v669_v23, %v672_v61  ;;  %v615_v9 = vsel %vm612_vm1, %v606_v52, %v609_v60  ;;  %v1486_v42 = vld [vmem:[%s3382_s3 + $0x280] sm:$0xff]  ;;  %v1505_v52 = vld [vmem:[%s3382_s3 + $0x318] sm:$0xff]  ;;  %v1488_v23 = vld [vmem:[%s3382_s3 + $0x290] sm:$0xff] }
 0x138   :  { %v651_v11 = vmul.f32 %v2944_v55, %v624_v6  ;;  %v660_v63 = vmul.f32 %v2993_v21, %v615_v9  ;;  %v1489_v60 = vld [vmem:[%s3382_s3 + $0x298] sm:$0xff]  ;;  %v1506_v61 = vld [vmem:[%s3382_s3 + $0x320] sm:$0xff]  ;;  %v2032_v4 = vpack.c.bf16 %v1487_v45, %v1486_v42  ;;  %v1970_v6 = vpack.c.bf16 %v1469_v47, %v1468_v46 }
 0x139   :  { %v738_v9 = vld [vmem:[%s3382_s3 + $0x80] sm:$0xff]  ;;  %v2038_v18 = vpack.c.bf16 %v1507_v62, %v1506_v61 }
 0x13a   :  { %1741 = vmatprep.mubr.msk.f32.mxu0 %vm795_vm3, %v651_v11  ;;  %v739_v11 = vld [vmem:[%s3382_s3 + $0x88] sm:$0xff] }
 0x13b   :  { %1742 = vmatmul.mubr.msk.f32.vlgmr.msra.gmra.mrb[8].mxu0 %vm795_vm3, %v654_v16 }
 0x13c   :  { %2017 = vmatpush3.bf16.msra.mxu0 %v2016_v13  ;;  %1744 = vmatprep.mubr.msk.f32.mxu0 %vm795_vm3, %v657_v14  ;;  %v2034_v14 = vpack.c.bf16 %v1505_v52, %v1504_v51 }
 0x13d   :  { %2019 = vmatprep.subr.bf16.mxu0 %v2018_v17  ;;  %v2036_v17 = vpack.c.bf16 %v1489_v60, %v1488_v23 }
 0x13f   :  { %1745 = vmatmul.mubr.msk.f32.gmra.mrb[10].mxu0 %vm795_vm3, %v660_v63 }
 0x140   :  { %2021 = vmatpush3.bf16.msra.mxu0 %v2020_v24  ;;  %v1974_v24 = vpack.c.bf16 %v739_v11, %v738_v9 }
 0x141   :  { %2023 = vmatprep.subr.bf16.mxu0 %v2022_v26 }
 0x143   :  { %v393_v39 = vpop.f32.mrb[0].mxu0 }
 0x144   :  { %2025 = vmatpush3.bf16.msra.mxu0 %v2024_v3  ;;  %v2058_v31 = vadd.f32 %v393_v39, %v3021_v33  ;;  %v395_v40 = vpop.f32.mrb[1].mxu0  ;;  %v1509_v39 = vld [vmem:[%s3382_s3 + $0x338] sm:$0xff] }
 0x145   :  { %v2059_v19 = vadd.f32 %v395_v40, %v3024_v34  ;;  %2027 = vmatprep.subr.bf16.mxu0 %v2026_v50  ;;  %v3115_v40 = vpop.permute.xlu0 %692  ;;  %v2042_v62 = vpack.c.bf16 %v1509_v39, %v1508_v37  ;;  %v1513_v37 = vld [vmem:[%s3382_s3 + $0x358] sm:$0xff] }
 0x146   :  { %v3061_v53 = vmax.f32 %v2058_v31, 0.0  ;;  %v725_v39 = vld [vmem:[%s3382_s3 + $0x18] sm:$0xff] }
 0x147   :  { %v3063_v54 = vmax.f32 %v2059_v19, 0.0  ;;  %v399_v58 = vpop.f32.mrb[2].mxu0  ;;  %v2040_v19 = vpack.c.bf16 %v1491_v32, %v1490_v0  ;;  %v741_v0 = vld [vmem:[%s3382_s3 + $0x98] sm:$0xff] }
 0x148   :  { %2029 = vmatpush3.bf16.msra.mxu0 %v2028_v41  ;;  %v2060_v1 = vadd.f32 %v399_v58, %v3021_v33  ;;  %v401_v2 = vpop.f32.mrb[3].mxu0  ;;  %v598_v20 = vrot.slane %v3061_v53, 7  ;;  %v661_v44 = vrot.slane %v3061_v53, 1 }
 0x149   :  { %v2061_v13 = vadd.f32 %v401_v2, %v3024_v34  ;;  %872 = vmatprep.mubr.f32.mxu1 %v3063_v54  ;;  %2031 = vmatprep.subr.bf16.mxu0 %v2030_v43  ;;  %v599_v25 = vrot.slane %v3063_v54, 7 }
 0x14a   :  { %v589_v16 = vmax.f32 %v2060_v1, 0.0  ;;  %873 = vmatmul.mubr.f32.vlgmr.msra.gmra.mrb[16].mxu1 %v3061_v53  ;;  %v1492_v1 = vld [vmem:[%s3382_s3 + $0x2b0] sm:$0xff] }
 0x14b   :  { %v590_v22 = vmax.f32 %v2061_v13, 0.0  ;;  %1969 = vmatpush3.bf16.msra.mxu1 %v2912_v15  ;;  %v405_v63 = vpop.f32.mrb[4].mxu0  ;;  %v662_v15 = vrot.slane %v3063_v54, 1 }
 0x14c   :  { %v601_v26 = vrot.slane %v589_v16, 7  ;;  %v664_v27 = vrot.slane %v589_v16, 1  ;;  %2033 = vmatpush3.bf16.msra.mxu0 %v2032_v4  ;;  %v2062_v28 = vadd.f32 %v405_v63, %v3021_v33  ;;  %v407_v30 = vpop.f32.mrb[5].mxu0  ;;  %1971 = vmatprep.subr.bf16.mxu1 %v1970_v6  ;;  %v723_v63 = vld [vmem:[%s3382_s3 + $0x8] sm:$0xff] }
 0x14d   :  { %v602_v3 = vrot.slane %v590_v22, 7  ;;  %v665_v50 = vrot.slane %v590_v22, 1  ;;  %v2063_v36 = vadd.f32 %v407_v30, %v3024_v34  ;;  %877 = vmatprep.mubr.f32.mxu1 %v590_v22  ;;  %2035 = vmatprep.subr.bf16.mxu0 %v2034_v14  ;;  %v722_v22 = vld [vmem:[%s3382_s3] sm:$0xff]  ;;  %v740_v30 = vld [vmem:[%s3382_s3 + $0x90] sm:$0xff] }
 0x14e   :  { %v3101_v8 = vsel %vm673_vm2, %v661_v44, %v664_v27  ;;  %v592_v12 = vmax.f32 %v2062_v28, 0.0  ;;  %878 = vmatmul.mubr.f32.gmra.mrb[18].mxu1 %v589_v16  ;;  %v3113_v31 = vsel %vm612_vm1, %v598_v20, %v601_v26 }
 0x14f   :  { %v3117_v41 = vmax.f32 %v2063_v36, 0.0  ;;  %v411_v42 = vpop.f32.mrb[6].mxu0  ;;  %1973 = vmatpush3.bf16.msra.mxu1 %v1970_v6  ;;  %v681_v43 = vsel %vm673_vm2, %v662_v15, %v665_v50  ;;  %v3127_v45 = vsel %vm612_vm1, %v599_v25, %v602_v3  ;;  %v1511_v6 = vld [vmem:[%s3382_s3 + $0x348] sm:$0xff]  ;;  %v1976_v36 = vpack.c.bf16 %v723_v63, %v722_v22  ;;  %v748_v22 = vld [vmem:[%s3382_s3 + $0xd0] sm:$0xff]  ;;  %v749_v63 = vld [vmem:[%s3382_s3 + $0xd8] sm:$0xff] }
 0x150   :  { %v604_v46 = vrot.slane %v592_v12, 7  ;;  %v667_v47 = vrot.slane %v592_v12, 1  ;;  %2037 = vmatpush3.bf16.msra.mxu0 %v2036_v17  ;;  %v2064_v51 = vadd.f32 %v411_v42, %v3021_v33  ;;  %v413_v52 = vpop.f32.mrb[7].mxu0  ;;  %v711_v23 = vmul.f32 %v3115_v40, %v681_v43  ;;  %1975 = vmatprep.subr.bf16.mxu1 %v1974_v24  ;;  %v1493_v33 = vld [vmem:[%s3382_s3 + $0x2b8] sm:$0xff] }
 0x151   :  { %v605_v58 = vrot.slane %v3117_v41, 7  ;;  %v668_v60 = vrot.slane %v3117_v41, 1  ;;  %v2065_v61 = vadd.f32 %v413_v52, %v3024_v34  ;;  %882 = vmatprep.mubr.f32.mxu1 %v3117_v41  ;;  %2039 = vmatprep.subr.bf16.mxu0 %v2038_v18  ;;  %v1510_v34 = vld [vmem:[%s3382_s3 + $0x340] sm:$0xff]  ;;  %v2044_v18 = vpack.c.bf16 %v1493_v33, %v1492_v1  ;;  %v3216_v41 = vpop.permute.xlu1 %697  ;;  %v728_v33 = vld [vmem:[%s3382_s3 + $0x30] sm:$0xff] }
 0x152   :  { %v595_v2 = vmax.f32 %v2064_v51, 0.0  ;;  %883 = vmatmul.mubr.f32.gmra.mrb[20].mxu1 %v592_v12  ;;  %1273 = vmatprep.mubr.f32.mxu0 %v711_v23  ;;  %v677_v4 = vsel %vm673_vm2, %v664_v27, %v667_v47  ;;  %v3151_v9 = vsel %vm612_vm1, %v601_v26, %v604_v46  ;;  %v3165_v27 = vpack.c.bf16 %v1511_v6, %v1510_v34  ;;  %v3244_v51 = vpop.permute.xlu0 %702  ;;  %v747_v34 = vld [vmem:[%s3382_s3 + $0xc8] sm:$0xff] }
 0x153   :  { %v596_v11 = vmax.f32 %v2065_v61, 0.0  ;;  %v678_v13 = vsel %vm673_vm2, %v665_v50, %v668_v60  ;;  %v3157_v14 = vsel %vm612_vm1, %v602_v3, %v605_v58  ;;  %v710_v42 = vmul.f32 %v3115_v40, %v3101_v8  ;;  %v743_v8 = vld [vmem:[%s3382_s3 + $0xa8] sm:$0xff] }
 0x154   :  { %v607_v16 = vrot.slane %v595_v2, 7  ;;  %v670_v17 = vrot.slane %v595_v2, 1  ;;  %2041 = vmatpush3.bf16.msra.mxu0 %v2040_v19  ;;  %v1978_v19 = vpack.c.bf16 %v741_v0, %v740_v30  ;;  %v714_v54 = vmul.f32 %v3216_v41, %v678_v13  ;;  %v732_v30 = vld [vmem:[%s3382_s3 + $0x50] sm:$0xff]  ;;  %v733_v0 = vld [vmem:[%s3382_s3 + $0x58] sm:$0xff] }
 0x155   :  { %v608_v24 = vrot.slane %v596_v11, 7  ;;  %v671_v26 = vrot.slane %v596_v11, 1  ;;  %887 = vmatprep.mubr.f32.mxu1 %v596_v11  ;;  %2043 = vmatprep.subr.bf16.mxu0 %v2042_v62  ;;  %v713_v52 = vmul.f32 %v3216_v41, %v677_v4  ;;  %v746_v4 = vld [vmem:[%s3382_s3 + $0xc0] sm:$0xff] }
 0x156   :  { %v622_v28 = vsel %vm612_vm1, %v607_v16, %v598_v20  ;;  %888 = vmatmul.mubr.f32.gmra.mrb[22].mxu1 %v595_v2  ;;  %v674_v32 = vsel %vm673_vm2, %v667_v47, %v670_v17  ;;  %v3183_v3 = vsel %vm673_vm2, %v670_v17, %v661_v44  ;;  %v3187_v20 = vsel %vm612_vm1, %v604_v46, %v607_v16  ;;  %v1512_v44 = vld [vmem:[%s3382_s3 + $0x350] sm:$0xff]  ;;  %v727_v47 = vld [vmem:[%s3382_s3 + $0x28] sm:$0xff]  ;;  %v3265_v2 = vpop.permute.xlu1 %707  ;;  %v730_v16 = vld [vmem:[%s3382_s3 + $0x40] sm:$0xff] }
 0x157   :  { %v3190_v50 = vmul.f32 %v2944_v55, %v622_v28  ;;  %1727 = vmatprep.mubr.msk.f32.mxu1 %vm795_vm3, %v2924_v35  ;;  %v675_v12 = vsel %vm673_vm2, %v668_v60, %v671_v26  ;;  %v623_v53 = vsel %vm612_vm1, %v608_v24, %v599_v25  ;;  %v724_v35 = vld [vmem:[%s3382_s3 + $0x10] sm:$0xff]  ;;  %v684_v25 = vsel %vm673_vm2, %v671_v26, %v662_v15  ;;  %v742_v15 = vld [vmem:[%s3382_s3 + $0xa0] sm:$0xff]  ;;  %v731_v17 = vld [vmem:[%s3382_s3 + $0x48] sm:$0xff] }
 0x158   :  { %2045 = vmatpush3.bf16.msra.mxu0 %v2044_v18  ;;  %v3223_v43 = vsel %vm612_vm1, %v605_v58, %v608_v24  ;;  %v3234_v46 = vpack.c.bf16 %v1513_v37, %v1512_v44  ;;  %v1980_v29 = vpack.c.bf16 %v725_v39, %v724_v35  ;;  %v1982_v23 = vpack.c.bf16 %v743_v8, %v742_v15  ;;  %v745_v58 = vld [vmem:[%s3382_s3 + $0xb8] sm:$0xff]  ;;  %v736_v39 = vld [vmem:[%s3382_s3 + $0x70] sm:$0xff] }
 0x159   :  { %2047 = vmatprep.subr.bf16.mxu0 %v3165_v27  ;;  %v717_v60 = vmul.f32 %v3244_v51, %v675_v12  ;;  %v650_v61 = vmul.f32 %v2944_v55, %v623_v53  ;;  %v716_v55 = vmul.f32 %v3244_v51, %v674_v32  ;;  %v720_v6 = vmul.f32 %v3265_v2, %v684_v25  ;;  %v734_v12 = vld [vmem:[%s3382_s3 + $0x60] sm:$0xff]  ;;  %v752_v53 = vld [vmem:[%s3382_s3 + $0xf0] sm:$0xff]  ;;  %v753_v44 = vld [vmem:[%s3382_s3 + $0xf8] sm:$0xff] }
 0x15a   :  { %1728 = vmatmul.mubr.msk.f32.vlgmr.msra.gmra.mrb[24].mxu1 %vm795_vm3, %v2926_v38  ;;  %v726_v38 = vld [vmem:[%s3382_s3 + $0x20] sm:$0xff]  ;;  %v1990_v13 = vpack.c.bf16 %v747_v34, %v746_v4  ;;  %v719_v18 = vmul.f32 %v3265_v2, %v3183_v3  ;;  %v712_v24 = vmul.f32 %v3115_v40, %v2940_v49  ;;  %v1992_v26 = vpack.c.bf16 %v731_v17, %v730_v16  ;;  %v751_v40 = vld [vmem:[%s3382_s3 + $0xe8] sm:$0xff]  ;;  %v737_v25 = vld [vmem:[%s3382_s3 + $0x78] sm:$0xff] }
 0x15b   :  { %1274 = vmatmul.mubr.f32.vlgmr.msra.gmra.mrb[12].mxu0 %v710_v42  ;;  %1977 = vmatpush3.bf16.msra.mxu1 %v1976_v36  ;;  %v1984_v62 = vpack.c.bf16 %v727_v47, %v726_v38  ;;  %v1994_v28 = vpack.c.bf16 %v749_v63, %v748_v22  ;;  %v715_v32 = vmul.f32 %v3216_v41, %v2950_v57  ;;  %v750_v49 = vld [vmem:[%s3382_s3 + $0xe0] sm:$0xff]  ;;  %v735_v57 = vld [vmem:[%s3382_s3 + $0x68] sm:$0xff] }
 0x15c   :  { %1278 = vmatprep.mubr.f32.mxu0 %v714_v54  ;;  %1730 = vmatprep.mubr.msk.f32.mxu1 %vm795_vm3, %v2936_v48  ;;  %v744_v48 = vld [vmem:[%s3382_s3 + $0xb0] sm:$0xff]  ;;  %v1996_v3 = vpack.c.bf16 %v733_v0, %v732_v30  ;;  %v1998_v36 = vpack.c.bf16 %v751_v40, %v750_v49  ;;  %v2000_v37 = vpack.c.bf16 %v735_v57, %v734_v12  ;;  %v1518_v40 = vld [vmem:[%s3383_s4] ss:$0 sm:$0xff] }
 0x15d   :  { %1979 = vmatprep.subr.bf16.mxu1 %v1978_v19  ;;  %2049 = vmatpush3.bf16.msra.mxu0 %v3165_v27  ;;  %v1986_v1 = vpack.c.bf16 %v745_v58, %v744_v48  ;;  %v2002_v35 = vpack.c.bf16 %v753_v44, %v752_v53  ;;  %v2004_v41 = vpack.c.bf16 %v737_v25, %v736_v39  ;;  %v1394_v53 = vld [vmem:[%s3384_s5] sm:$0xff] }
 0x15e   :  { %1731 = vmatmul.mubr.msk.f32.gmra.mrb[26].mxu1 %vm795_vm3, %v2946_v56  ;;  %2051 = vmatprep.subr.bf16.mxu0 %v3234_v46  ;;  %v729_v56 = vld [vmem:[%s3382_s3 + $0x38] sm:$0xff]  ;;  %v653_v42 = vmul.f32 %v2982_v10, %v3127_v45  ;;  %v652_v19 = vmul.f32 %v2982_v10, %v3113_v31  ;;  %v656_v54 = vmul.f32 %v2954_v59, %v3157_v14 }
 0x15f   :  { %1279 = vmatmul.mubr.f32.gmra.mrb[14].mxu0 %v713_v52  ;;  %1981 = vmatpush3.bf16.msra.mxu1 %v1980_v29  ;;  %v1988_v11 = vpack.c.bf16 %v729_v56, %v728_v33  ;;  %v655_v45 = vmul.f32 %v2954_v59, %v3151_v9  ;;  %v658_v10 = vmul.f32 %v2993_v21, %v3187_v20 }
 0x160   :  { %1283 = vmatprep.mubr.f32.mxu0 %v717_v60  ;;  %1054 = vmatprep.mubr.f32.mxu1 %v650_v61  ;;  %v718_v31 = vmul.f32 %v3244_v51, %v2978_v7  ;;  %v721_v14 = vmul.f32 %v3265_v2, %v2972_v5 }
 0x161   :  { %1983 = vmatprep.subr.bf16.mxu1 %v1982_v23  ;;  %2053 = vmatpush3.bf16.msra.mxu0 %v3234_v46 }
 0x163   :  { %1284 = vmatmul.mubr.f32.gmra.mrb[16].mxu0 %v716_v55  ;;  %1985 = vmatpush3.bf16.msra.mxu1 %v1984_v62 }
 0x164   :  { %1288 = vmatprep.mubr.f32.mxu0 %v720_v6  ;;  %1987 = vmatprep.subr.bf16.mxu1 %v1986_v1 }
 0x167   :  { %1289 = vmatmul.mubr.f32.gmra.mrb[18].mxu0 %v719_v18  ;;  %1989 = vmatpush3.bf16.msra.mxu1 %v1988_v11 }
 0x168   :  { %1755 = vmatprep.mubr.msk.f32.mxu0 %vm795_vm3, %v712_v24  ;;  %1991 = vmatprep.subr.bf16.mxu1 %v1990_v13 }
 0x16b   :  { %1756 = vmatmul.mubr.msk.f32.vlgmr.msra.gmra.mrb[8].mxu0 %vm795_vm3, %v715_v32  ;;  %1993 = vmatpush3.bf16.msra.mxu1 %v1992_v26 }
 0x16c   :  { %1995 = vmatprep.subr.bf16.mxu1 %v1994_v28 }
 0x16f   :  { %1997 = vmatpush3.bf16.msra.mxu1 %v1996_v3 }
 0x170   :  { %1999 = vmatprep.subr.bf16.mxu1 %v1998_v36 }
 0x173   :  { %2001 = vmatpush3.bf16.msra.mxu1 %v2000_v37 }
 0x174   :  { %2003 = vmatprep.subr.bf16.mxu1 %v2002_v35 }
 0x177   :  { %2005 = vmatpush3.bf16.msra.mxu1 %v2004_v41 }
 0x178   :  { %2054 = vmatprep.subr.bf16.mxu1 %v3165_v27 }
 0x17a   :  { %1055 = vmatmul.mubr.f32.vlgmr.msra.gmra.mrb[28].mxu1 %v3190_v50  ;;  %v659_v50 = vmul.f32 %v2993_v21, %v3223_v43 }
 0x17b   :  { %1059 = vmatprep.mubr.f32.mxu1 %v653_v42  ;;  %2056 = vmatpush3.bf16.msra.mxu1 %v3165_v27 }
 0x17c   :  { %2055 = vmatprep.subr.bf16.mxu1 %v3234_v46 }
 0x17e   :  { %1060 = vmatmul.mubr.f32.gmra.mrb[30].mxu1 %v652_v19 }
 0x17f   :  { %1064 = vmatprep.mubr.f32.mxu1 %v656_v54  ;;  %2057 = vmatpush3.bf16.msra.mxu1 %v3234_v46  ;;  %v1395_v54 = vld [vmem:[%s3384_s5 + $0x8] sm:$0xff] }
 0x182   :  { %1065 = vmatmul.mubr.f32.gmra.mrb[32].mxu1 %v655_v45 }
 0x183   :  { %1069 = vmatprep.mubr.f32.mxu1 %v659_v50 }
 0x186   :  { %1070 = vmatmul.mubr.f32.gmra.mrb[34].mxu1 %v658_v10 }
 0x187   :  { %1758 = vmatprep.mubr.msk.f32.mxu1 %vm795_vm3, %v718_v31 }
 0x18a   :  { %1759 = vmatmul.mubr.msk.f32.vlgmr.msra.gmra.mrb[36].mxu1 %vm795_vm3, %v721_v14 }
 0x212   :  { %v3349_v59 = vpop.f32.mrb[10].mxu0 }
 0x213   :  { %v1151_v9 = vpop.f32.mrb[11].mxu0 }
 0x21d   :  { %v1595_v27 = vpop.f32.mrb[16].mxu1 }
 0x21e   :  { %v1596_v43 = vpop.f32.mrb[17].mxu1 }
 0x21f   :  { %v1597_v15 = vadd.f32 %v1596_v43, %v1595_v27 }
 0x221   :  { %v1598_v8 = vpop.f32.mrb[18].mxu1 }
 0x222   :  { %v1599_v46 = vpop.f32.mrb[19].mxu1 }
 0x223   :  { %v1600_v21 = vadd.f32 %v1599_v46, %v1598_v8 }
 0x225   :  { %v1601_v20 = vpop.f32.mrb[20].mxu1 }
 0x226   :  { %v1602_v29 = vpop.f32.mrb[21].mxu1 }
 0x227   :  { %v1603_v7 = vadd.f32 %v1602_v29, %v1601_v20  ;;  %v1396_v29 = vld [vmem:[%s3384_s5 + $0x10] sm:$0xff] }
 0x229   :  { %v1604_v38 = vpop.f32.mrb[22].mxu1 }
 0x22a   :  { %v1605_v47 = vpop.f32.mrb[23].mxu1 }
 0x22b   :  { %v1606_v51 = vadd.f32 %v1605_v47, %v1604_v38 }
 0x22d   :  { %v1729_v52 = vpop.f32.mrb[24].mxu1 }
 0x22e   :  { %v1699_v23 = vpop.f32.mrb[12].mxu0  ;;  %v965_v5 = vadd.f32 %v1729_v52, %v1600_v21  ;;  %v959_v48 = vpop.f32.mrb[25].mxu1 }
 0x22f   :  { %v1700_v58 = vpop.f32.mrb[13].mxu0  ;;  %v960_v60 = vadd.f32 %v1597_v15, %v959_v48 }
 0x230   :  { %v1701_v61 = vadd.f32 %v1700_v58, %v1699_v23 }
 0x231   :  { %v1732_v62 = vpop.f32.mrb[26].mxu1 }
 0x232   :  { %v1702_v1 = vpop.f32.mrb[14].mxu0  ;;  %v975_v33 = vadd.f32 %v1732_v62, %v1606_v51  ;;  %v969_v56 = vpop.f32.mrb[27].mxu1 }
 0x233   :  { %v1703_v2 = vpop.f32.mrb[15].mxu0  ;;  %v970_v55 = vadd.f32 %v1603_v7, %v969_v56 }
 0x234   :  { %v1704_v4 = vadd.f32 %v1703_v2, %v1702_v1 }
 0x236   :  { %v1705_v34 = vpop.f32.mrb[16].mxu0 }
 0x237   :  { %v1706_v6 = vpop.f32.mrb[17].mxu0 }
 0x238   :  { %v1707_v11 = vadd.f32 %v1706_v6, %v1705_v34 }
 0x23a   :  { %v1708_v13 = vpop.f32.mrb[18].mxu0 }
 0x23b   :  { %v1709_v16 = vpop.f32.mrb[19].mxu0 }
 0x23c   :  { %v1710_v17 = vadd.f32 %v1709_v16, %v1708_v13 }
 0x23e   :  { %v1757_v18 = vpop.f32.mrb[8].mxu0 }
 0x23f   :  { %v1360_v22 = vpop.f32.mrb[9].mxu0 }
 0x24d   :  { %v1647_v63 = vpop.f32.mrb[28].mxu1 }
 0x24e   :  { %v1648_v24 = vpop.f32.mrb[29].mxu1 }
 0x24f   :  { %v1649_v26 = vadd.f32 %v1648_v24, %v1647_v63 }
 0x251   :  { %v1057_v28 = vadd.f32 %v1649_v26, %v960_v60  ;;  %v1650_v30 = vpop.f32.mrb[30].mxu1 }
 0x252   :  { %v1651_v0 = vpop.f32.mrb[31].mxu1 }
 0x253   :  { %v2072_v32 = vadd.f32 %v1701_v61, %v1057_v28  ;;  %v1652_v49 = vadd.f32 %v1651_v0, %v1650_v30 }
 0x255   :  { %v2073_v3 = vadd.f32 %v2072_v32, %v1360_v22  ;;  %v1062_v36 = vadd.f32 %v1652_v49, %v965_v5  ;;  %v1653_v12 = vpop.f32.mrb[32].mxu1 }
 0x256   :  { %v1654_v57 = vpop.f32.mrb[33].mxu1 }
 0x257   :  { %v2068_v44 = vadd.f32 %v1704_v4, %v1062_v36  ;;  %v1655_v37 = vadd.f32 %v1654_v57, %v1653_v12  ;;  %v1390_v35 = vadd.f32 %v2073_v3, %v1518_v40 }
 0x259   :  { %v2069_v39 = vadd.f32 %v2068_v44, %v1757_v18  ;;  %v1067_v25 = vadd.f32 %v1655_v37, %v970_v55  ;;  %v1656_v41 = vpop.f32.mrb[34].mxu1  ;;  %v1398_v42 = vadd.f32 %v1394_v53, %v1390_v35 }
 0x25a   :  { %v1657_v19 = vpop.f32.mrb[35].mxu1 }
 0x25b   :  { %v1658_v45 = vadd.f32 %v1657_v19, %v1656_v41  ;;  %v1391_v50 = vadd.f32 %v2069_v39, %v1518_v40  ;;  %v1402_v10 = vmax.f32 %v1398_v42, 0.0  ;;  %v1152_v31 = vadd.f32 %v1151_v9, %v1067_v25  ;;  %v1397_v9 = vld [vmem:[%s3384_s5 + $0x18] sm:$0xff] }
 0x25d   :  { %v1072_v14 = vadd.f32 %v1658_v45, %v975_v33  ;;  %v1760_v27 = vpop.f32.mrb[36].mxu1  ;;  %v1399_v43 = vadd.f32 %v1395_v54, %v1391_v50  ;;  %1406 = vst [vmem:[#allocation2] sm:$0xff] %v1402_v10  ;;  %v2082_v15 = vadd.f32 %v1707_v11, %v1152_v31 }
 0x25e   :  { %v1370_v8 = vpop.f32.mrb[37].mxu1 }
 0x25f   :  { %v1157_v46 = vadd.f32 %v3349_v59, %v1072_v14  ;;  %v1403_v21 = vmax.f32 %v1399_v43, 0.0  ;;  %v2083_v20 = vadd.f32 %v2082_v15, %v1370_v8 }
 0x261   :  { %v2077_v7 = vadd.f32 %v1710_v17, %v1157_v46  ;;  %1407 = vst [vmem:[#allocation2 + $0x8] sm:$0xff] %v1403_v21  ;;  %v1392_v38 = vadd.f32 %v2083_v20, %v1518_v40 }
 0x263   :  { %v2078_v47 = vadd.f32 %v2077_v7, %v1760_v27  ;;  %v1400_v51 = vadd.f32 %v1396_v29, %v1392_v38 }
 0x265   :  { %v1393_v52 = vadd.f32 %v2078_v47, %v1518_v40  ;;  %v1404_v23 = vmax.f32 %v1400_v51, 0.0 }
 0x267   :  { %v1401_v59 = vadd.f32 %v1397_v9, %v1393_v52  ;;  %1408 = vst [vmem:[#allocation2 + $0x10] sm:$0xff] %v1404_v23 }
 0x269   :  { %v1405_v5 = vmax.f32 %v1401_v59, 0.0 }
 0x26b   :  { %1409 = vst [vmem:[#allocation2 + $0x18] sm:$0xff] %v1405_v5 }
 0x26c   :  { %2112 = shalt.err (!%p2109_p4)
}
 0x26d   :  { %s2113_s5 = scalar_lea.hbm %s3387_s8, 512 }
 0x26e   :  { %p2114_p5 = scmp.ne.s32.totalorder %s3387_s8, %s2113_s5  ;;  %p2117_p6 = scmp.lt.u32.totalorder %s2113_s5, %s3387_s8 }
 0x270   :  { %p2119_p7 = pnand %p2117_p6, %p2114_p5 }
 0x272   :  { %2122 = shalt.err (!%p2119_p7)
}
 0x273   :  { %s2128_s12 = smov 128   ;;  %s2129_s6 = smov 8  }
 0x274   :  { %1421 = dma.vmem_to_hbm [thread:$0]  %s1416_s26, 512, %s3387_s8, [#allocation3], %s2128_s12, %s2128_s12, %s2129_s6  }
 0x275   :  { %2123 = dma.done.wait [#allocation3], 512  }
 0x276   :  { %2124 = vsyncadd [#allocation3], 4294966784 }
 0x277   :  { %1425 = vsyncpa [#allocation3], 1 }

</bundles_post_ra>
